<compile_context>
chip_gen: v7x
topology: tpu7x:2x2x1
jax: 0.10.0
libtpu: 0.0.40
codegen_flags: <defaults>
</compile_context>

<pallas_src>
import functools

import jax
import jax.numpy as jnp
from jax.experimental import pallas as pl
from jax.experimental.pallas import tpu as pltpu

LANE = 128       # feature width inside the kernel (nhid / nclass padded to this)
MAX_TILE = 512   # A row/column tile (review: sweep 256/512; 512 best)


def _round_up(a, b):
    return (a + b - 1) // b * b


@functools.lru_cache(maxsize=None)
def _vmem_limit_bytes():
    mib = 1024 * 1024
    try:
        cap = int(pltpu.get_tpu_info().vmem_capacity_bytes)
    except Exception:
        cap = 64 * mib  # conservative fallback (v7x per-TC size)
    # v5e/v6e (128 MiB) -> ~100 MiB; v7x (64 MiB/TC) -> ~48 MiB.
    return int(max(32 * mib, min(100 * mib, cap - 16 * mib)))


# ----------------------------------------------------------------------------
# One SAGEConv layer with pre-projected operands:
#   out = act( invdeg * (A @ Sl) + Sr )
#     Sl = S @ W_l        (aggregation operand, bf16)
#     Sr = S @ W_r + bias (self term, f32)
# Grid = (row-tile i, contraction-tile k), f32 accumulator across k.
# ----------------------------------------------------------------------------
def _sage_layer_kernel(a_ref, sl_ref, sr_ref, invdeg_ref, o_ref, acc_ref, *,
                       apply_relu):
    k = pl.program_id(1)

    @pl.when(k == 0)
    def _():
        acc_ref[...] = jnp.zeros_like(acc_ref)

    # Neighbor-count-weighted sum on the MXU (bf16 x bf16 -> f32 accumulate).
    acc_ref[...] += jnp.dot(a_ref[...], sl_ref[...],
                            preferred_element_type=jnp.float32)

    @pl.when(k == pl.num_programs(1) - 1)
    def _():
        r = acc_ref[...] * invdeg_ref[...] + sr_ref[...]   # mean + self + bias
        if apply_relu:
            r = jnp.maximum(r, 0.0)
        o_ref[...] = r.astype(o_ref.dtype)


def _sage_layer(a, sl, sr, inv_deg, *, tile, apply_relu, out_dtype):
    n_pad = a.shape[0]
    r_tiles = n_pad // tile
    k_tiles = n_pad // tile

    out_itemsize = jnp.dtype(out_dtype).itemsize
    flops = 2 * n_pad * n_pad * LANE
    bytes_accessed = (a.size * 2 + r_tiles * sl.size * 2 + sr.size * 4
                      + inv_deg.size * 4 + n_pad * LANE * out_itemsize)

    return pl.pallas_call(
        functools.partial(_sage_layer_kernel, apply_relu=apply_relu),
        out_shape=jax.ShapeDtypeStruct((n_pad, LANE), out_dtype),
        grid_spec=pltpu.PrefetchScalarGridSpec(
            num_scalar_prefetch=0,
            grid=(r_tiles, k_tiles),
            in_specs=[
                pl.BlockSpec((tile, tile), lambda i, k: (i, k)),   # A counts
                pl.BlockSpec((tile, LANE), lambda i, k: (k, 0)),   # Sl (streamed per k)
                pl.BlockSpec((tile, LANE), lambda i, k: (i, 0)),   # Sr (streamed per i)
                pl.BlockSpec((tile, 1), lambda i, k: (i, 0)),      # 1/deg
            ],
            out_specs=pl.BlockSpec((tile, LANE), lambda i, k: (i, 0)),
            scratch_shapes=[pltpu.VMEM((tile, LANE), jnp.float32)],
        ),
        compiler_params=pltpu.CompilerParams(
            dimension_semantics=("parallel", "arbitrary"),
            vmem_limit_bytes=_vmem_limit_bytes(),
        ),
        cost_estimate=pl.CostEstimate(flops=flops, transcendentals=0,
                                      bytes_accessed=bytes_accessed),
    )(a, sl, sr, inv_deg)


# ----------------------------------------------------------------------------
# Wrapper: dense adjacency, pre-projections, two fused aggregation kernels
# ----------------------------------------------------------------------------
def _pad2d(x, rows, cols, dtype):
    out = jnp.zeros((rows, cols), dtype)
    return out.at[:x.shape[0], :x.shape[1]].set(x.astype(dtype))


@functools.partial(jax.jit, static_argnames=("activation",))
def graphsage_forward(params, x, edge_index, *, activation=True):
    n, nfeat = x.shape
    nhid = params["b1"].shape[1]
    nclass = params["b2"].shape[1]
    # nfeat is absorbed by the wrapper-side pre-projection; only the kernel's
    # feature width (nhid / nclass) must fit one lane slab.
    assert max(nhid, nclass) <= LANE  # TODO(synk): tile hidden/class dims > 128

    if n <= MAX_TILE:
        n_pad = _round_up(n, LANE)
        tile = n_pad
    else:
        tile = MAX_TILE
        n_pad = _round_up(n, MAX_TILE)

    # Dense adjacency of *unnormalized* neighbor counts (exact small ints in
    # bf16, exact for counts <= 256) + per-row 1/deg applied after the matmul
    # (mean aggregation).  Isolated nodes aggregate to zero, matching PyG.
    # TODO(synk): for real graph sizes replace the dense O(N^2) adjacency with
    # a CSR scalar-prefetch gather kernel (PrefetchScalarGridSpec, O(E*F)).
    src, dst = edge_index[0], edge_index[1]
    counts = jnp.zeros((n_pad, n_pad), jnp.float32).at[dst, src].add(1.0)
    deg = counts.sum(axis=1, keepdims=True)
    inv_deg = jnp.where(deg > 0, 1.0 / jnp.maximum(deg, 1.0), 0.0)
    a = counts.astype(jnp.bfloat16)
    # TODO(synk): on v7x, an fp8(e4m3) A (exact for multiplicity <= 16) would
    # halve the dominant HBM stream; not portable to v5e/v6e, so bf16 kept.

    xb = jnp.zeros((n_pad, nfeat), jnp.bfloat16).at[:n].set(x.astype(jnp.bfloat16))

    def pad_w(w, rows, cols):
        wp = jnp.zeros((rows, cols), jnp.bfloat16)
        return wp.at[:w.shape[0], :w.shape[1]].set(w.astype(jnp.bfloat16))

    # ---- layer 1: pre-project, then A contraction kernel -> H (bf16, HBM) ----
    w1l = pad_w(params["w1_l_t"], nfeat, LANE)
    w1r = pad_w(params["w1_r_t"], nfeat, LANE)
    b1p = _pad2d(params["b1"], 1, LANE, jnp.float32)
    xl = jnp.dot(xb, w1l, preferred_element_type=jnp.float32).astype(jnp.bfloat16)
    xr = jnp.dot(xb, w1r, preferred_element_type=jnp.float32) + b1p

    h = _sage_layer(a, xl, xr, inv_deg, tile=tile, apply_relu=activation,
                    out_dtype=jnp.bfloat16)
    # F.dropout in eval mode (training=False) is the identity here.
    # TODO(synk): training-mode dropout RNG not reproduced.

    # ---- layer 2: pre-project H, then A contraction kernel -> out (f32) ----
    w2l = pad_w(params["w2_l_t"], LANE, LANE)
    w2r = pad_w(params["w2_r_t"], LANE, LANE)
    b2p = _pad2d(params["b2"], 1, LANE, jnp.float32)
    hl = jnp.dot(h, w2l, preferred_element_type=jnp.float32).astype(jnp.bfloat16)
    hr = jnp.dot(h, w2r, preferred_element_type=jnp.float32) + b2p

    out = _sage_layer(a, hl, hr, inv_deg, tile=tile, apply_relu=False,
                      out_dtype=jnp.float32)
    return out[:n, :nclass]


# ----------------------------------------------------------------------------
# Parameter init + pure-JAX reference (canonical aggregate-then-project order)
# ----------------------------------------------------------------------------
def init_params(key, nfeat, nhid, nclass):
    k1, k2, k3, k4, k5, k6 = jax.random.split(key, 6)

    def glorot(k, fan_in, fan_out):
        scale = jnp.sqrt(6.0 / (fan_in + fan_out))
        return jax.random.uniform(k, (fan_in, fan_out), jnp.float32, -scale, scale)

    return {
        # stored pre-transposed: [in, out]
        "w1_l_t": glorot(k1, nfeat, nhid),
        "w1_r_t": glorot(k2, nfeat, nhid),
        "b1": 0.1 * jax.random.normal(k5, (1, nhid), jnp.float32),
        "w2_l_t": glorot(k3, nhid, nclass),
        "w2_r_t": glorot(k4, nhid, nclass),
        "b2": 0.1 * jax.random.normal(k6, (1, nclass), jnp.float32),
    }


def ref_forward(params, x, edge_index, activation=True):
    n = x.shape[0]
    src, dst = edge_index[0], edge_index[1]
    counts = jnp.zeros((n, n), jnp.float32).at[dst, src].add(1.0)
    deg = counts.sum(axis=1, keepdims=True)
    inv_deg = jnp.where(deg > 0, 1.0 / jnp.maximum(deg, 1.0), 0.0)
    a = counts.astype(jnp.bfloat16)

    def sage(s_bf16, wl, wr, b):
        agg = jnp.dot(a, s_bf16, preferred_element_type=jnp.float32) * inv_deg
        return (jnp.dot(agg.astype(jnp.bfloat16), wl.astype(jnp.bfloat16),
                        preferred_element_type=jnp.float32)
                + jnp.dot(s_bf16, wr.astype(jnp.bfloat16),
                          preferred_element_type=jnp.float32) + b)

    h = sage(x.astype(jnp.bfloat16), params["w1_l_t"], params["w1_r_t"],
             params["b1"])
    if activation:
        h = jnp.maximum(h, 0.0)
    out = sage(h.astype(jnp.bfloat16), params["w2_l_t"], params["w2_r_t"],
               params["b2"])
    return out


if __name__ == "__main__":
    N, NFEAT, NHID, NCLASS, E = 200, 32, 32, 16, 800

    key = jax.random.PRNGKey(0)
    kx, ke, kp = jax.random.split(key, 3)

    x = jax.random.normal(kx, (N, NFEAT), jnp.float32)
    edge_index = jax.random.randint(ke, (2, E), 0, N, dtype=jnp.int32)
    params = init_params(kp, NFEAT, NHID, NCLASS)

    out = graphsage_forward(params, x, edge_index, activation=True)
    out = jax.block_until_ready(out)
    assert out.shape == (N, NCLASS)

    ref = ref_forward(params, x, edge_index, activation=True)
    max_err = float(jnp.max(jnp.abs(out - ref)))
    assert jnp.allclose(out, ref, atol=3e-2, rtol=3e-2), max_err

    print("KERNEL_OK")
</pallas_src>

<mosaic_0001>
module attributes {stable_mosaic.version = 11 : i64} {
  func.func private @main(%arg0: i32) attributes {dimension_semantics = [#tpu.dimension_semantics<core_parallel>], iteration_bounds = array<i64: 2>, tpu.core_type = #tpu.core_type<sc_scalar_subcore>, window_params = []} {
    return
  }
}

module attributes {stable_mosaic.version = 11 : i64} {
  func.func private @main(%arg0: i32) attributes {dimension_semantics = [#tpu.dimension_semantics<core_parallel>], iteration_bounds = array<i64: 2>, tpu.core_type = #tpu.core_type<sc_scalar_subcore>, window_params = []} {
    return
  }
}

module attributes {stable_mosaic.version = 11 : i64} {
  func.func @_sage_layer_kernel(%arg0: i32, %arg1: i32, %arg2: memref<256x256xbf16, #tpu.memory_space<vmem>>, %arg3: memref<256x128xbf16, #tpu.memory_space<vmem>>, %arg4: memref<256x128xf32, #tpu.memory_space<vmem>>, %arg5: memref<256x1xf32, #tpu.memory_space<vmem>>, %arg6: memref<256x128xf32, #tpu.memory_space<vmem>>, %arg7: memref<256x128xf32, #tpu.memory_space<vmem>>) attributes {dimension_semantics = [#tpu.dimension_semantics<parallel>, #tpu.dimension_semantics<arbitrary>], iteration_bounds = array<i64: 1, 1>, scalar_prefetch = 0 : i64, scratch_operands = 1 : i64, tpu.core_type = #tpu.core_type<tc>, window_params = [{transform_indices = @transform_0, window_bounds = array<i64: 256, 256>}, {transform_indices = @transform_1, window_bounds = array<i64: 256, 128>}, {transform_indices = @transform_2, window_bounds = array<i64: 256, 128>}, {transform_indices = @transform_3, window_bounds = array<i64: 256, 1>}, {transform_indices = @transform_4, window_bounds = array<i64: 256, 128>}]} {
    %c0_i32 = arith.constant 0 : i32
    %0 = arith.cmpi eq, %arg1, %c0_i32 : i32
    %1 = arith.extui %0 : i1 to i32
    %c0_i32_0 = arith.constant 0 : i32
    %2 = arith.cmpi ne, %1, %c0_i32_0 : i32
    scf.if %2 {
      %cst_10 = arith.constant 0.000000e+00 : f32
      %12 = vector.broadcast %cst_10 : f32 to vector<256x128xf32>
      %c0_11 = arith.constant 0 : index
      %c0_12 = arith.constant 0 : index
      %13 = vector.load %arg7[%c0_11, %c0_12] : memref<256x128xf32, #tpu.memory_space<vmem>>, vector<256x128xf32>
      tpu.vector_store %arg7[%c0_11, %c0_12], %12 {strides = array<i32>} : memref<256x128xf32, #tpu.memory_space<vmem>>, vector<256x128xf32>,
    } else {
    }
    %c0 = arith.constant 0 : index
    %c0_1 = arith.constant 0 : index
    %3 = vector.load %arg7[%c0, %c0_1] : memref<256x128xf32, #tpu.memory_space<vmem>>, vector<256x128xf32>
    %c0_2 = arith.constant 0 : index
    %c0_3 = arith.constant 0 : index
    %4 = vector.load %arg2[%c0_2, %c0_3] : memref<256x256xbf16, #tpu.memory_space<vmem>>, vector<256x256xbf16>
    %c0_4 = arith.constant 0 : index
    %c0_5 = arith.constant 0 : index
    %5 = vector.load %arg3[%c0_4, %c0_5] : memref<256x128xbf16, #tpu.memory_space<vmem>>, vector<256x128xbf16>
    %cst = arith.constant dense<0.000000e+00> : vector<256x128xf32>
    %6 = tpu.matmul %4, %5, %cst {dimension_numbers = #tpu.dot_dimension_numbers<[1], [0], [0], [1], [0, 0, 1, 1], [], []>} : vector<256x256xbf16>, vector<256x128xbf16>, vector<256x128xf32> -> vector<256x128xf32>
    %7 = arith.addf %3, %6 : vector<256x128xf32>
    %c0_6 = arith.constant 0 : index
    %c0_7 = arith.constant 0 : index
    %8 = vector.load %arg7[%c0_6, %c0_7] : memref<256x128xf32, #tpu.memory_space<vmem>>, vector<256x128xf32>
    tpu.vector_store %arg7[%c0_6, %c0_7], %7 {strides = array<i32>} : memref<256x128xf32, #tpu.memory_space<vmem>>, vector<256x128xf32>,
    %c0_i32_8 = arith.constant 0 : i32
    %9 = arith.cmpi eq, %arg1, %c0_i32_8 : i32
    %10 = arith.extui %9 : i1 to i32
    %c0_i32_9 = arith.constant 0 : i32
    %11 = arith.cmpi ne, %10, %c0_i32_9 : i32
    scf.if %11 {
      %c0_10 = arith.constant 0 : index
      %c0_11 = arith.constant 0 : index
      %12 = vector.load %arg7[%c0_10, %c0_11] : memref<256x128xf32, #tpu.memory_space<vmem>>, vector<256x128xf32>
      %c0_12 = arith.constant 0 : index
      %c0_13 = arith.constant 0 : index
      %13 = vector.load %arg5[%c0_12, %c0_13] : memref<256x1xf32, #tpu.memory_space<vmem>>, vector<256x1xf32>
      %14 = vector.broadcast %13 : vector<256x1xf32> to vector<256x128xf32>
      %15 = arith.mulf %12, %14 : vector<256x128xf32>
      %c0_14 = arith.constant 0 : index
      %c0_15 = arith.constant 0 : index
      %16 = vector.load %arg4[%c0_14, %c0_15] : memref<256x128xf32, #tpu.memory_space<vmem>>, vector<256x128xf32>
      %17 = arith.addf %15, %16 : vector<256x128xf32>
      %c0_16 = arith.constant 0 : index
      %c0_17 = arith.constant 0 : index
      %18 = vector.load %arg6[%c0_16, %c0_17] : memref<256x128xf32, #tpu.memory_space<vmem>>, vector<256x128xf32>
      tpu.vector_store %arg6[%c0_16, %c0_17], %17 {strides = array<i32>} : memref<256x128xf32, #tpu.memory_space<vmem>>, vector<256x128xf32>,
    } else {
    }
    return
  }
  func.func @transform_0(%arg0: i32, %arg1: i32) -> (i32, i32) {
    %c0_i32 = arith.constant 0 : i32
    return %arg0, %arg1 : i32, i32
  }
  func.func @transform_1(%arg0: i32, %arg1: i32) -> (i32, i32) {
    %c0_i32 = arith.constant 0 : i32
    %c0_i32_0 = arith.constant 0 : i32
    return %arg1, %c0_i32 : i32, i32
  }
  func.func @transform_2(%arg0: i32, %arg1: i32) -> (i32, i32) {
    %c0_i32 = arith.constant 0 : i32
    %c0_i32_0 = arith.constant 0 : i32
    return %arg0, %c0_i32 : i32, i32
  }
  func.func @transform_3(%arg0: i32, %arg1: i32) -> (i32, i32) {
    %c0_i32 = arith.constant 0 : i32
    %c0_i32_0 = arith.constant 0 : i32
    return %arg0, %c0_i32 : i32, i32
  }
  func.func @transform_4(%arg0: i32, %arg1: i32) -> (i32, i32) {
    %c0_i32 = arith.constant 0 : i32
    %c0_i32_0 = arith.constant 0 : i32
    return %arg0, %c0_i32 : i32, i32
  }
}

module attributes {stable_mosaic.version = 11 : i64} {
  func.func @_sage_layer_kernel(%arg0: i32, %arg1: i32, %arg2: memref<256x256xbf16, #tpu.memory_space<vmem>>, %arg3: memref<256x128xbf16, #tpu.memory_space<vmem>>, %arg4: memref<256x128xf32, #tpu.memory_space<vmem>>, %arg5: memref<256x1xf32, #tpu.memory_space<vmem>>, %arg6: memref<256x128xbf16, #tpu.memory_space<vmem>>, %arg7: memref<256x128xf32, #tpu.memory_space<vmem>>) attributes {dimension_semantics = [#tpu.dimension_semantics<parallel>, #tpu.dimension_semantics<arbitrary>], iteration_bounds = array<i64: 1, 1>, scalar_prefetch = 0 : i64, scratch_operands = 1 : i64, tpu.core_type = #tpu.core_type<tc>, window_params = [{transform_indices = @transform_0, window_bounds = array<i64: 256, 256>}, {transform_indices = @transform_1, window_bounds = array<i64: 256, 128>}, {transform_indices = @transform_2, window_bounds = array<i64: 256, 128>}, {transform_indices = @transform_3, window_bounds = array<i64: 256, 1>}, {transform_indices = @transform_4, window_bounds = array<i64: 256, 128>}]} {
    %c0_i32 = arith.constant 0 : i32
    %0 = arith.cmpi eq, %arg1, %c0_i32 : i32
    %1 = arith.extui %0 : i1 to i32
    %c0_i32_0 = arith.constant 0 : i32
    %2 = arith.cmpi ne, %1, %c0_i32_0 : i32
    scf.if %2 {
      %cst_10 = arith.constant 0.000000e+00 : f32
      %12 = vector.broadcast %cst_10 : f32 to vector<256x128xf32>
      %c0_11 = arith.constant 0 : index
      %c0_12 = arith.constant 0 : index
      %13 = vector.load %arg7[%c0_11, %c0_12] : memref<256x128xf32, #tpu.memory_space<vmem>>, vector<256x128xf32>
      tpu.vector_store %arg7[%c0_11, %c0_12], %12 {strides = array<i32>} : memref<256x128xf32, #tpu.memory_space<vmem>>, vector<256x128xf32>,
    } else {
    }
    %c0 = arith.constant 0 : index
    %c0_1 = arith.constant 0 : index
    %3 = vector.load %arg7[%c0, %c0_1] : memref<256x128xf32, #tpu.memory_space<vmem>>, vector<256x128xf32>
    %c0_2 = arith.constant 0 : index
    %c0_3 = arith.constant 0 : index
    %4 = vector.load %arg2[%c0_2, %c0_3] : memref<256x256xbf16, #tpu.memory_space<vmem>>, vector<256x256xbf16>
    %c0_4 = arith.constant 0 : index
    %c0_5 = arith.constant 0 : index
    %5 = vector.load %arg3[%c0_4, %c0_5] : memref<256x128xbf16, #tpu.memory_space<vmem>>, vector<256x128xbf16>
    %cst = arith.constant dense<0.000000e+00> : vector<256x128xf32>
    %6 = tpu.matmul %4, %5, %cst {dimension_numbers = #tpu.dot_dimension_numbers<[1], [0], [0], [1], [0, 0, 1, 1], [], []>} : vector<256x256xbf16>, vector<256x128xbf16>, vector<256x128xf32> -> vector<256x128xf32>
    %7 = arith.addf %3, %6 : vector<256x128xf32>
    %c0_6 = arith.constant 0 : index
    %c0_7 = arith.constant 0 : index
    %8 = vector.load %arg7[%c0_6, %c0_7] : memref<256x128xf32, #tpu.memory_space<vmem>>, vector<256x128xf32>
    tpu.vector_store %arg7[%c0_6, %c0_7], %7 {strides = array<i32>} : memref<256x128xf32, #tpu.memory_space<vmem>>, vector<256x128xf32>,
    %c0_i32_8 = arith.constant 0 : i32
    %9 = arith.cmpi eq, %arg1, %c0_i32_8 : i32
    %10 = arith.extui %9 : i1 to i32
    %c0_i32_9 = arith.constant 0 : i32
    %11 = arith.cmpi ne, %10, %c0_i32_9 : i32
    scf.if %11 {
      %c0_10 = arith.constant 0 : index
      %c0_11 = arith.constant 0 : index
      %12 = vector.load %arg7[%c0_10, %c0_11] : memref<256x128xf32, #tpu.memory_space<vmem>>, vector<256x128xf32>
      %c0_12 = arith.constant 0 : index
      %c0_13 = arith.constant 0 : index
      %13 = vector.load %arg5[%c0_12, %c0_13] : memref<256x1xf32, #tpu.memory_space<vmem>>, vector<256x1xf32>
      %14 = vector.broadcast %13 : vector<256x1xf32> to vector<256x128xf32>
      %15 = arith.mulf %12, %14 : vector<256x128xf32>
      %c0_14 = arith.constant 0 : index
      %c0_15 = arith.constant 0 : index
      %16 = vector.load %arg4[%c0_14, %c0_15] : memref<256x128xf32, #tpu.memory_space<vmem>>, vector<256x128xf32>
      %17 = arith.addf %15, %16 : vector<256x128xf32>
      %cst_16 = arith.constant 0.000000e+00 : f32
      %18 = vector.broadcast %cst_16 : f32 to vector<256x128xf32>
      %19 = arith.maximumf %17, %18 : vector<256x128xf32>
      %20 = arith.truncf %19 : vector<256x128xf32> to vector<256x128xbf16>
      %c0_17 = arith.constant 0 : index
      %c0_18 = arith.constant 0 : index
      %21 = vector.load %arg6[%c0_17, %c0_18] : memref<256x128xbf16, #tpu.memory_space<vmem>>, vector<256x128xbf16>
      tpu.vector_store %arg6[%c0_17, %c0_18], %20 {strides = array<i32>} : memref<256x128xbf16, #tpu.memory_space<vmem>>, vector<256x128xbf16>,
    } else {
    }
    return
  }
  func.func @transform_0(%arg0: i32, %arg1: i32) -> (i32, i32) {
    %c0_i32 = arith.constant 0 : i32
    return %arg0, %arg1 : i32, i32
  }
  func.func @transform_1(%arg0: i32, %arg1: i32) -> (i32, i32) {
    %c0_i32 = arith.constant 0 : i32
    %c0_i32_0 = arith.constant 0 : i32
    return %arg1, %c0_i32 : i32, i32
  }
  func.func @transform_2(%arg0: i32, %arg1: i32) -> (i32, i32) {
    %c0_i32 = arith.constant 0 : i32
    %c0_i32_0 = arith.constant 0 : i32
    return %arg0, %c0_i32 : i32, i32
  }
  func.func @transform_3(%arg0: i32, %arg1: i32) -> (i32, i32) {
    %c0_i32 = arith.constant 0 : i32
    %c0_i32_0 = arith.constant 0 : i32
    return %arg0, %c0_i32 : i32, i32
  }
  func.func @transform_4(%arg0: i32, %arg1: i32) -> (i32, i32) {
    %c0_i32 = arith.constant 0 : i32
    %c0_i32_0 = arith.constant 0 : i32
    return %arg0, %c0_i32 : i32, i32
  }
}

</mosaic_0001>

<bundles_post_ra>
// kernel: graphsage_forward.3
= control target key start
LH: loop header
LB: loop body
LE: loop exit
PB: predicated region body
PF: predicated region fallthrough
CT: control target
= control target key end

     0   :  { %v1233_v1 = vmov 0   ;;  %s1730_s1 = inlined_call_operand.vmem [shape: bf16[256,128], index: 1, kind: input, shape index: {}]   ;;  %s1731_s0 = inlined_call_operand.vmem [shape: bf16[256,256], index: 0, kind: input, shape index: {}]   ;;  %s1732_s3 = inlined_call_operand.vmem [shape: f32[256,1], index: 3, kind: input, shape index: {}]   ;;  %s1733_s2 = inlined_call_operand.vmem [shape: f32[256,128], index: 2, kind: input, shape index: {}]   ;;  %s1734_s4 = inlined_call_operand.vmem [shape: f32[256,128], index: 4, kind: output, shape index: {}]  }
   0x1   :  { %v1169_v0 = vld [vmem:[%s1730_s1 + $0x40] sm:$0xff]   ;;  %1168 = vset.pattern.permute.xlu1 %v1233_v1  ;;  %1167 = vset.pattern.permute.xlu0 %v1233_v1  ;;  %v1171_v3 = vld [vmem:[%s1730_s1 + $0x48] sm:$0xff]   ;;  %v1173_v5 = vld [vmem:[%s1730_s1 + $0x50] sm:$0xff]  }
   0x2   :  { %v1170_v2 = vld [vmem:[%s1730_s1] sm:$0xff]   ;;  %1038 = vmatprep.subr.bf16.mxu0 %v1169_v0  ;;  %1150 = vmatprep.subr.bf16.mxu1 %v1169_v0  ;;  %v1172_v4 = vld [vmem:[%s1730_s1 + $0x8] sm:$0xff]   ;;  %v1174_v6 = vld [vmem:[%s1730_s1 + $0x10] sm:$0xff]  }
   0x3   :  { %1039 = vmatpush3.bf16.msra.mxu0 %v1170_v2  ;;  %1158 = vmatpush3.bf16.msra.mxu1 %v1170_v2  ;;  %v1175_v7 = vld [vmem:[%s1730_s1 + $0x58] sm:$0xff]   ;;  %v1177_v9 = vld [vmem:[%s1730_s1 + $0x60] sm:$0xff]   ;;  %v1179_v11 = vld [vmem:[%s1730_s1 + $0x68] sm:$0xff]  }
   0x4   :  { %1040 = vmatprep.subr.bf16.mxu0 %v1171_v3  ;;  %1151 = vmatprep.subr.bf16.mxu1 %v1171_v3  ;;  %v1176_v8 = vld [vmem:[%s1730_s1 + $0x18] sm:$0xff]   ;;  %v1178_v10 = vld [vmem:[%s1730_s1 + $0x20] sm:$0xff]   ;;  %v1180_v14 = vld [vmem:[%s1730_s1 + $0x28] sm:$0xff]  }
   0x5   :  { %v1187_v12 = vld [vmem:[%s1731_s0 + $0x4] ss:$8 sps:$4 sm:$0xff]   ;;  %v1181_v15 = vld [vmem:[%s1730_s1 + $0x70] sm:$0xff]   ;;  %v1183_v17 = vld [vmem:[%s1730_s1 + $0x78] sm:$0xff]  }
   0x6   :  { %v1190_v13 = vld [vmem:[%s1731_s0 + $0x84] ss:$8 sps:$4 sm:$0xff]   ;;  %438 = vmatprep.mubr.bf16.mxu0 %v1187_v12  ;;  %v1182_v16 = vld [vmem:[%s1730_s1 + $0x30] sm:$0xff]   ;;  %v1184_v19 = vld [vmem:[%s1730_s1 + $0x38] sm:$0xff]  }
   0x7   :  { %1041 = vmatpush3.bf16.msra.mxu0 %v1172_v4  ;;  %1159 = vmatpush3.bf16.msra.mxu1 %v1172_v4  ;;  %v668_v18 = vld [vmem:[%s1732_s3 + $0x10] sm:$0xff]  ;;  %v666_v20 = vld [vmem:[%s1732_s3] sm:$0xff]  ;;  %v669_v23 = vld [vmem:[%s1732_s3 + $0x18] sm:$0xff] }
   0x8   :  { %1042 = vmatprep.subr.bf16.mxu0 %v1173_v5  ;;  %1152 = vmatprep.subr.bf16.mxu1 %v1173_v5  ;;  %v1185_v21 = vld [vmem:[%s1731_s0] ss:$8 sps:$4 sm:$0xff]   ;;  %v1191_v25 = vld [vmem:[%s1731_s0 + $0x14] ss:$8 sps:$4 sm:$0xff]   ;;  %v1195_v29 = vld [vmem:[%s1731_s0 + $0x10] ss:$8 sps:$4 sm:$0xff]  }
   0x9   :  { %502 = vmatprep.mubr.bf16.mxu1 %v1190_v13  ;;  %710 = vperm.xlu1 %1168, %v668_v18   ;;  %v1188_v22 = vld [vmem:[%s1731_s0 + $0x80] ss:$8 sps:$4 sm:$0xff]   ;;  %v1193_v26 = vld [vmem:[%s1731_s0 + $0x94] ss:$8 sps:$4 sm:$0xff]   ;;  %v1196_v30 = vld [vmem:[%s1731_s0 + $0x90] ss:$8 sps:$4 sm:$0xff]  }
   0xa   :  { %700 = vperm.xlu0 %1167, %v666_v20   ;;  %v667_v24 = vld [vmem:[%s1732_s3 + $0x8] sm:$0xff]  ;;  %v670_v28 = vld [vmem:[%s1732_s3 + $0x20] sm:$0xff]  ;;  %v673_v31 = vld [vmem:[%s1732_s3 + $0x38] sm:$0xff] }
   0xb   :  { %1043 = vmatpush3.bf16.msra.mxu0 %v1174_v6  ;;  %1160 = vmatpush3.bf16.msra.mxu1 %v1174_v6  ;;  %v671_v27 = vld [vmem:[%s1732_s3 + $0x28] sm:$0xff]  ;;  %v672_v32 = vld [vmem:[%s1732_s3 + $0x30] sm:$0xff]  ;;  %v674_v36 = vld [vmem:[%s1732_s3 + $0x40] sm:$0xff] }
   0xc   :  { %1044 = vmatprep.subr.bf16.mxu0 %v1175_v7  ;;  %1153 = vmatprep.subr.bf16.mxu1 %v1175_v7  ;;  %v1197_v33 = vld [vmem:[%s1731_s0 + $0x24] ss:$8 sps:$4 sm:$0xff]   ;;  %v1201_v37 = vld [vmem:[%s1731_s0 + $0x20] ss:$8 sps:$4 sm:$0xff]   ;;  %v677_v39 = vld [vmem:[%s1732_s3 + $0x58] sm:$0xff] }
   0xd   :  { %715 = vperm.xlu1 %1168, %v669_v23   ;;  %v1199_v34 = vld [vmem:[%s1731_s0 + $0xa4] ss:$8 sps:$4 sm:$0xff]   ;;  %v1202_v38 = vld [vmem:[%s1731_s0 + $0xa0] ss:$8 sps:$4 sm:$0xff]   ;;  %v676_v40 = vld [vmem:[%s1732_s3 + $0x50] sm:$0xff] }
   0xe   :  { %705 = vperm.xlu0 %1167, %v667_v24   ;;  %v675_v35 = vld [vmem:[%s1732_s3 + $0x48] sm:$0xff]  ;;  %v1203_v41 = vld [vmem:[%s1731_s0 + $0x34] ss:$8 sps:$4 sm:$0xff]   ;;  %v678_v44 = vld [vmem:[%s1732_s3 + $0x60] sm:$0xff] }
   0xf   :  { %1045 = vmatpush3.bf16.msra.mxu0 %v1176_v8  ;;  %1161 = vmatpush3.bf16.msra.mxu1 %v1176_v8  ;;  %v1205_v42 = vld [vmem:[%s1731_s0 + $0xb4] ss:$8 sps:$4 sm:$0xff]   ;;  %v679_v43 = vld [vmem:[%s1732_s3 + $0x68] sm:$0xff]  ;;  %v1207_v45 = vld [vmem:[%s1731_s0 + $0x30] ss:$8 sps:$4 sm:$0xff]  }
  0x10   :  { %1046 = vmatprep.subr.bf16.mxu0 %v1177_v9  ;;  %1154 = vmatprep.subr.bf16.mxu1 %v1177_v9  ;;  %v1208_v46 = vld [vmem:[%s1731_s0 + $0xb0] ss:$8 sps:$4 sm:$0xff]   ;;  %v1209_v49 = vld [vmem:[%s1731_s0 + $0x44] ss:$8 sps:$4 sm:$0xff]   ;;  %v1213_v53 = vld [vmem:[%s1731_s0 + $0x40] ss:$8 sps:$4 sm:$0xff]  }
  0x11   :  { %725 = vperm.xlu1 %1168, %v671_v27   ;;  %v681_v47 = vld [vmem:[%s1732_s3 + $0x78] sm:$0xff]  ;;  %v680_v48 = vld [vmem:[%s1732_s3 + $0x70] sm:$0xff]  ;;  %v1211_v50 = vld [vmem:[%s1731_s0 + $0xc4] ss:$8 sps:$4 sm:$0xff]  }
  0x12   :  { %720 = vperm.xlu0 %1167, %v670_v28   ;;  %v683_v51 = vld [vmem:[%s1732_s3 + $0x88] sm:$0xff]  ;;  %v682_v52 = vld [vmem:[%s1732_s3 + $0x80] sm:$0xff]  ;;  %v685_v55 = vld [vmem:[%s1732_s3 + $0x98] sm:$0xff] }
  0x13   :  { %1047 = vmatpush3.bf16.msra.mxu0 %v1178_v10  ;;  %1162 = vmatpush3.bf16.msra.mxu1 %v1178_v10  ;;  %v1214_v54 = vld [vmem:[%s1731_s0 + $0xc0] ss:$8 sps:$4 sm:$0xff]   ;;  %v684_v56 = vld [vmem:[%s1732_s3 + $0x90] sm:$0xff]  ;;  %v689_v63 = vld [vmem:[%s1732_s3 + $0xb8] sm:$0xff] }
  0x14   :  { %1048 = vmatprep.subr.bf16.mxu0 %v1179_v11  ;;  %1155 = vmatprep.subr.bf16.mxu1 %v1179_v11  ;;  %v1215_v57 = vld [vmem:[%s1731_s0 + $0x54] ss:$8 sps:$4 sm:$0xff]   ;;  %v687_v59 = vld [vmem:[%s1732_s3 + $0xa8] sm:$0xff]  ;;  %v686_v60 = vld [vmem:[%s1732_s3 + $0xa0] sm:$0xff] }
  0x15   :  { %735 = vperm.xlu1 %1168, %v673_v31   ;;  %v1217_v58 = vld [vmem:[%s1731_s0 + $0xd4] ss:$8 sps:$4 sm:$0xff]   ;;  %v1219_v61 = vld [vmem:[%s1731_s0 + $0x50] ss:$8 sps:$4 sm:$0xff]   ;;  %v1221_v1 = vld [vmem:[%s1731_s0 + $0x64] ss:$8 sps:$4 sm:$0xff]  }
  0x16   :  { %730 = vperm.xlu0 %1167, %v672_v32   ;;  %v1220_v62 = vld [vmem:[%s1731_s0 + $0xd0] ss:$8 sps:$4 sm:$0xff]   ;;  %v1223_v2 = vld [vmem:[%s1731_s0 + $0xe4] ss:$8 sps:$4 sm:$0xff]   ;;  %v1225_v5 = vld [vmem:[%s1731_s0 + $0x60] ss:$8 sps:$4 sm:$0xff]  }
  0x17   :  { %1049 = vmatpush3.bf16.msra.mxu0 %v1180_v14  ;;  %1163 = vmatpush3.bf16.msra.mxu1 %v1180_v14  ;;  %v688_v0 = vld [vmem:[%s1732_s3 + $0xb0] sm:$0xff]  ;;  %v691_v3 = vld [vmem:[%s1732_s3 + $0xc8] sm:$0xff]  ;;  %v690_v4 = vld [vmem:[%s1732_s3 + $0xc0] sm:$0xff] }
  0x18   :  { %1050 = vmatprep.subr.bf16.mxu0 %v1181_v15  ;;  %1156 = vmatprep.subr.bf16.mxu1 %v1181_v15  ;;  %v1226_v6 = vld [vmem:[%s1731_s0 + $0xe0] ss:$8 sps:$4 sm:$0xff]   ;;  %v693_v7 = vld [vmem:[%s1732_s3 + $0xd8] sm:$0xff]  ;;  %v692_v8 = vld [vmem:[%s1732_s3 + $0xd0] sm:$0xff] }
  0x19   :  { %745 = vperm.xlu1 %1168, %v675_v35   ;;  %v1227_v9 = vld [vmem:[%s1731_s0 + $0x74] ss:$8 sps:$4 sm:$0xff]   ;;  %v695_v11 = vld [vmem:[%s1732_s3 + $0xe8] sm:$0xff]  ;;  %v694_v12 = vld [vmem:[%s1732_s3 + $0xe0] sm:$0xff] }
  0x1a   :  { %740 = vperm.xlu0 %1167, %v674_v36   ;;  %v1229_v10 = vld [vmem:[%s1731_s0 + $0xf4] ss:$8 sps:$4 sm:$0xff]   ;;  %v1231_v13 = vld [vmem:[%s1731_s0 + $0x70] ss:$8 sps:$4 sm:$0xff]  }
  0x1b   :  { %1051 = vmatpush3.bf16.msra.mxu0 %v1182_v16  ;;  %1164 = vmatpush3.bf16.msra.mxu1 %v1182_v16  ;;  %v1232_v14 = vld [vmem:[%s1731_s0 + $0xf0] ss:$8 sps:$4 sm:$0xff]  }
  0x1c   :  { %1052 = vmatprep.subr.bf16.mxu0 %v1183_v17  ;;  %1157 = vmatprep.subr.bf16.mxu1 %v1183_v17  ;;  %v697_v15 = vld [vmem:[%s1732_s3 + $0xf8] sm:$0xff]  ;;  %v696_v16 = vld [vmem:[%s1732_s3 + $0xf0] sm:$0xff] }
  0x1d   :  { %755 = vperm.xlu1 %1168, %v677_v39  }
  0x1e   :  { %750 = vperm.xlu0 %1167, %v676_v40  }
  0x1f   :  { %1053 = vmatpush3.bf16.msra.mxu0 %v1184_v19  ;;  %1165 = vmatpush3.bf16.msra.mxu1 %v1184_v19 }
  0x21   :  { %765 = vperm.xlu1 %1168, %v679_v43   ;;  %v906_v43 = vld [vmem:[%s1733_s2 + $0x80] sm:$0xff] }
  0x22   :  { %439 = vmatmul.mubr.bf16.vlgmr.msra.gmra.mrb[0].mxu0 %v1185_v21  ;;  %503 = vmatmul.mubr.bf16.vlgmr.msra.gmra.mrb[0].mxu1 %v1188_v22 }
  0x23   :  { %446 = vmatprep.mubr.bf16.mxu0 %v1191_v25  ;;  %510 = vmatprep.mubr.bf16.mxu1 %v1193_v26 }
  0x24   :  { %760 = vperm.xlu0 %1167, %v678_v44  }
  0x25   :  { %775 = vperm.xlu1 %1168, %v681_v47  }
  0x28   :  { %770 = vperm.xlu0 %1167, %v680_v48  }
  0x29   :  { %785 = vperm.xlu1 %1168, %v683_v51   ;;  %v891_v51 = vld [vmem:[%s1733_s2 + $0x8] sm:$0xff] }
  0x2a   :  { %447 = vmatmul.mubr.bf16.gmra.mrb[4].mxu0 %v1195_v29  ;;  %511 = vmatmul.mubr.bf16.gmra.mrb[4].mxu1 %v1196_v30 }
  0x2b   :  { %454 = vmatprep.mubr.bf16.mxu0 %v1197_v33  ;;  %518 = vmatprep.mubr.bf16.mxu1 %v1199_v34 }
  0x2c   :  { %780 = vperm.xlu0 %1167, %v682_v52   ;;  %v907_v52 = vld [vmem:[%s1733_s2 + $0x88] sm:$0xff] }
  0x2d   :  { %795 = vperm.xlu1 %1168, %v685_v55  }
  0x30   :  { %790 = vperm.xlu0 %1167, %v684_v56  }
  0x31   :  { %805 = vperm.xlu1 %1168, %v687_v59  }
  0x32   :  { %455 = vmatmul.mubr.bf16.gmra.mrb[8].mxu0 %v1201_v37  ;;  %519 = vmatmul.mubr.bf16.gmra.mrb[8].mxu1 %v1202_v38 }
  0x33   :  { %462 = vmatprep.mubr.bf16.mxu0 %v1203_v41  ;;  %526 = vmatprep.mubr.bf16.mxu1 %v1205_v42  ;;  %v890_v42 = vld [vmem:[%s1733_s2] sm:$0xff] }
  0x34   :  { %800 = vperm.xlu0 %1167, %v686_v60  }
  0x35   :  { %815 = vperm.xlu1 %1168, %v689_v63  }
  0x38   :  { %810 = vperm.xlu0 %1167, %v688_v0  }
  0x39   :  { %825 = vperm.xlu1 %1168, %v691_v3  }
  0x3a   :  { %463 = vmatmul.mubr.bf16.gmra.mrb[12].mxu0 %v1207_v45  ;;  %527 = vmatmul.mubr.bf16.gmra.mrb[12].mxu1 %v1208_v46 }
  0x3b   :  { %470 = vmatprep.mubr.bf16.mxu0 %v1209_v49  ;;  %534 = vmatprep.mubr.bf16.mxu1 %v1211_v50 }
  0x3c   :  { %820 = vperm.xlu0 %1167, %v690_v4   ;;  %v892_v4 = vld [vmem:[%s1733_s2 + $0x10] sm:$0xff] }
  0x3d   :  { %835 = vperm.xlu1 %1168, %v693_v7  }
  0x40   :  { %830 = vperm.xlu0 %1167, %v692_v8  }
  0x41   :  { %845 = vperm.xlu1 %1168, %v695_v11  }
  0x42   :  { %471 = vmatmul.mubr.bf16.gmra.mrb[16].mxu0 %v1213_v53  ;;  %535 = vmatmul.mubr.bf16.gmra.mrb[16].mxu1 %v1214_v54 }
  0x43   :  { %478 = vmatprep.mubr.bf16.mxu0 %v1215_v57  ;;  %542 = vmatprep.mubr.bf16.mxu1 %v1217_v58 }
  0x44   :  { %840 = vperm.xlu0 %1167, %v694_v12  }
  0x45   :  { %855 = vperm.xlu1 %1168, %v697_v15  }
  0x48   :  { %850 = vperm.xlu0 %1167, %v696_v16  }
  0x4a   :  { %479 = vmatmul.mubr.bf16.gmra.mrb[20].mxu0 %v1219_v61  ;;  %543 = vmatmul.mubr.bf16.gmra.mrb[20].mxu1 %v1220_v62 }
  0x4b   :  { %486 = vmatprep.mubr.bf16.mxu0 %v1221_v1  ;;  %550 = vmatprep.mubr.bf16.mxu1 %v1223_v2 }
  0x52   :  { %487 = vmatmul.mubr.bf16.gmra.mrb[24].mxu0 %v1225_v5  ;;  %551 = vmatmul.mubr.bf16.gmra.mrb[24].mxu1 %v1226_v6  ;;  %v908_v5 = vld [vmem:[%s1733_s2 + $0x90] sm:$0xff] }
  0x53   :  { %494 = vmatprep.mubr.bf16.mxu0 %v1227_v9  ;;  %558 = vmatprep.mubr.bf16.mxu1 %v1229_v10 }
  0x5a   :  { %495 = vmatmul.mubr.bf16.gmra.mrb[28].mxu0 %v1231_v13  ;;  %559 = vmatmul.mubr.bf16.gmra.mrb[28].mxu1 %v1232_v14  ;;  %v893_v13 = vld [vmem:[%s1733_s2 + $0x18] sm:$0xff] }
  0x5b   :  { %v909_v14 = vld [vmem:[%s1733_s2 + $0x98] sm:$0xff] }
  0x88   :  { %v711_v18 = vpop.permute.xlu1 %710 }
  0x89   :  { %v701_v17 = vpop.permute.xlu0 %700 }
  0x8c   :  { %v1499_v20 = vpop.permute.xlu1 %715 }
  0x8d   :  { %v706_v19 = vpop.permute.xlu0 %705 }
  0x90   :  { %v1503_v22 = vpop.permute.xlu1 %725 }
  0x91   :  { %v1501_v21 = vpop.permute.xlu0 %720 }
  0x94   :  { %v1507_v24 = vpop.permute.xlu1 %735 }
  0x95   :  { %v1505_v23 = vpop.permute.xlu0 %730 }
  0x98   :  { %v1511_v26 = vpop.permute.xlu1 %745 }
  0x99   :  { %v1509_v25 = vpop.permute.xlu0 %740 }
  0x9c   :  { %v1515_v28 = vpop.permute.xlu1 %755 }
  0x9d   :  { %v1513_v27 = vpop.permute.xlu0 %750 }
  0xa0   :  { %v1519_v30 = vpop.permute.xlu1 %765 }
  0xa3   :  { %v1517_v29 = vpop.permute.xlu0 %760 }
  0xa4   :  { %v1523_v32 = vpop.permute.xlu1 %775 }
  0xa7   :  { %v1521_v31 = vpop.permute.xlu0 %770 }
  0xa8   :  { %v786_v50 = vpop.permute.xlu1 %785 }
  0xab   :  { %v781_v33 = vpop.permute.xlu0 %780 }
  0xac   :  { %v796_v12 = vpop.permute.xlu1 %795 }
  0xaf   :  { %v791_v57 = vpop.permute.xlu0 %790 }
  0xf5   :  { %v1054_v34 = vpop.f32.mrb[0].mxu0  ;;  %v1102_v35 = vpop.f32.mrb[0].mxu1 }
  0xf6   :  { %v1055_v36 = vpop.f32.mrb[1].mxu0  ;;  %v1103_v37 = vpop.f32.mrb[1].mxu1 }
  0xf7   :  { %v1056_v38 = vadd.f32 %v1055_v36, %v1054_v34  ;;  %v1104_v39 = vadd.f32 %v1103_v37, %v1102_v35  ;;  %v1057_v40 = vpop.f32.mrb[2].mxu0  ;;  %v1105_v41 = vpop.f32.mrb[2].mxu1 }
  0xf8   :  { %v1058_v44 = vpop.f32.mrb[3].mxu0  ;;  %v1106_v45 = vpop.f32.mrb[3].mxu1 }
  0xf9   :  { %v858_v46 = vmul.f32 %v1056_v38, %v701_v17  ;;  %v874_v47 = vmul.f32 %v1104_v39, %v781_v33  ;;  %v1059_v48 = vadd.f32 %v1058_v44, %v1057_v40  ;;  %v1107_v49 = vadd.f32 %v1106_v45, %v1105_v41  ;;  %v801_v33 = vpop.permute.xlu0 %800 }
  0xfb   :  { %v922_v53 = vadd.f32 %v890_v42, %v858_v46  ;;  %v938_v54 = vadd.f32 %v906_v43, %v874_v47  ;;  %v859_v55 = vmul.f32 %v1059_v48, %v706_v19  ;;  %v875_v56 = vmul.f32 %v1107_v49, %v786_v50  ;;  %v894_v42 = vld [vmem:[%s1733_s2 + $0x20] sm:$0xff]  ;;  %v806_v50 = vpop.permute.xlu1 %805 }
  0xfc   :  { %v910_v43 = vld [vmem:[%s1733_s2 + $0xa0] sm:$0xff] }
  0xfd   :  { %954 = vst [vmem:[%s1734_s4] sm:$0xff] %v922_v53  ;;  %970 = vst [vmem:[%s1734_s4 + $0x80] sm:$0xff] %v938_v54  ;;  %v923_v58 = vadd.f32 %v891_v51, %v859_v55  ;;  %v939_v59 = vadd.f32 %v907_v52, %v875_v56  ;;  %v1060_v60 = vpop.f32.mrb[4].mxu0  ;;  %v1108_v61 = vpop.f32.mrb[4].mxu1  ;;  %v895_v51 = vld [vmem:[%s1733_s2 + $0x28] sm:$0xff] }
  0xfe   :  { %v1061_v62 = vpop.f32.mrb[5].mxu0  ;;  %v1109_v63 = vpop.f32.mrb[5].mxu1  ;;  %v911_v52 = vld [vmem:[%s1733_s2 + $0xa8] sm:$0xff] }
  0xff   :  { %955 = vst [vmem:[%s1734_s4 + $0x8] sm:$0xff] %v923_v58  ;;  %971 = vst [vmem:[%s1734_s4 + $0x88] sm:$0xff] %v939_v59  ;;  %v1062_v0 = vadd.f32 %v1061_v62, %v1060_v60  ;;  %v1110_v1 = vadd.f32 %v1109_v63, %v1108_v61  ;;  %v1063_v2 = vpop.f32.mrb[6].mxu0  ;;  %v1111_v3 = vpop.f32.mrb[6].mxu1 }
 0x100   :  { %v1064_v6 = vpop.f32.mrb[7].mxu0  ;;  %v1112_v7 = vpop.f32.mrb[7].mxu1 }
 0x101   :  { %v860_v8 = vmul.f32 %v1062_v0, %v711_v18  ;;  %v876_v9 = vmul.f32 %v1110_v1, %v791_v57  ;;  %v1065_v10 = vadd.f32 %v1064_v6, %v1063_v2  ;;  %v1113_v11 = vadd.f32 %v1112_v7, %v1111_v3  ;;  %v811_v57 = vpop.permute.xlu0 %810  ;;  %v896_v2 = vld [vmem:[%s1733_s2 + $0x30] sm:$0xff] }
 0x102   :  { %v912_v3 = vld [vmem:[%s1733_s2 + $0xb0] sm:$0xff] }
 0x103   :  { %v924_v15 = vadd.f32 %v892_v4, %v860_v8  ;;  %v940_v16 = vadd.f32 %v908_v5, %v876_v9  ;;  %v861_v17 = vmul.f32 %v1065_v10, %v1499_v20  ;;  %v877_v19 = vmul.f32 %v1113_v11, %v796_v12  ;;  %v816_v10 = vpop.permute.xlu1 %815  ;;  %v897_v11 = vld [vmem:[%s1733_s2 + $0x38] sm:$0xff] }
 0x104   :  { %v913_v12 = vld [vmem:[%s1733_s2 + $0xb8] sm:$0xff] }
 0x105   :  { %956 = vst [vmem:[%s1734_s4 + $0x10] sm:$0xff] %v924_v15  ;;  %972 = vst [vmem:[%s1734_s4 + $0x90] sm:$0xff] %v940_v16  ;;  %v925_v18 = vadd.f32 %v893_v13, %v861_v17  ;;  %v941_v34 = vadd.f32 %v909_v14, %v877_v19  ;;  %v1066_v35 = vpop.f32.mrb[8].mxu0  ;;  %v1114_v36 = vpop.f32.mrb[8].mxu1 }
 0x106   :  { %v1067_v37 = vpop.f32.mrb[9].mxu0  ;;  %v1115_v38 = vpop.f32.mrb[9].mxu1 }
 0x107   :  { %957 = vst [vmem:[%s1734_s4 + $0x18] sm:$0xff] %v925_v18  ;;  %973 = vst [vmem:[%s1734_s4 + $0x98] sm:$0xff] %v941_v34  ;;  %v1068_v20 = vadd.f32 %v1067_v37, %v1066_v35  ;;  %v1116_v39 = vadd.f32 %v1115_v38, %v1114_v36  ;;  %v1069_v40 = vpop.f32.mrb[10].mxu0  ;;  %v1117_v41 = vpop.f32.mrb[10].mxu1 }
 0x108   :  { %v1070_v44 = vpop.f32.mrb[11].mxu0  ;;  %v1118_v45 = vpop.f32.mrb[11].mxu1 }
 0x109   :  { %v862_v46 = vmul.f32 %v1068_v20, %v1501_v21  ;;  %v878_v47 = vmul.f32 %v1116_v39, %v801_v33  ;;  %v1071_v48 = vadd.f32 %v1070_v44, %v1069_v40  ;;  %v1119_v49 = vadd.f32 %v1118_v45, %v1117_v41  ;;  %v821_v17 = vpop.permute.xlu0 %820  ;;  %v898_v20 = vld [vmem:[%s1733_s2 + $0x40] sm:$0xff] }
 0x10a   :  { %v914_v39 = vld [vmem:[%s1733_s2 + $0xc0] sm:$0xff] }
 0x10b   :  { %v926_v53 = vadd.f32 %v894_v42, %v862_v46  ;;  %v942_v54 = vadd.f32 %v910_v43, %v878_v47  ;;  %v863_v55 = vmul.f32 %v1071_v48, %v1503_v22  ;;  %v879_v56 = vmul.f32 %v1119_v49, %v806_v50  ;;  %v826_v46 = vpop.permute.xlu1 %825  ;;  %v899_v47 = vld [vmem:[%s1733_s2 + $0x48] sm:$0xff] }
 0x10c   :  { %v915_v48 = vld [vmem:[%s1733_s2 + $0xc8] sm:$0xff] }
 0x10d   :  { %958 = vst [vmem:[%s1734_s4 + $0x20] sm:$0xff] %v926_v53  ;;  %974 = vst [vmem:[%s1734_s4 + $0xa0] sm:$0xff] %v942_v54  ;;  %v927_v21 = vadd.f32 %v895_v51, %v863_v55  ;;  %v943_v58 = vadd.f32 %v911_v52, %v879_v56  ;;  %v1072_v59 = vpop.f32.mrb[12].mxu0  ;;  %v1120_v60 = vpop.f32.mrb[12].mxu1 }
 0x10e   :  { %v1073_v61 = vpop.f32.mrb[13].mxu0  ;;  %v1121_v62 = vpop.f32.mrb[13].mxu1 }
 0x10f   :  { %959 = vst [vmem:[%s1734_s4 + $0x28] sm:$0xff] %v927_v21  ;;  %975 = vst [vmem:[%s1734_s4 + $0xa8] sm:$0xff] %v943_v58  ;;  %v1074_v22 = vadd.f32 %v1073_v61, %v1072_v59  ;;  %v1122_v63 = vadd.f32 %v1121_v62, %v1120_v60  ;;  %v1075_v0 = vpop.f32.mrb[14].mxu0  ;;  %v1123_v1 = vpop.f32.mrb[14].mxu1  ;;  %v900_v61 = vld [vmem:[%s1733_s2 + $0x50] sm:$0xff] }
 0x110   :  { %v1076_v4 = vpop.f32.mrb[15].mxu0  ;;  %v1124_v5 = vpop.f32.mrb[15].mxu1  ;;  %v916_v62 = vld [vmem:[%s1733_s2 + $0xd0] sm:$0xff] }
 0x111   :  { %v864_v6 = vmul.f32 %v1074_v22, %v1505_v23  ;;  %v880_v7 = vmul.f32 %v1122_v63, %v811_v57  ;;  %v1077_v8 = vadd.f32 %v1076_v4, %v1075_v0  ;;  %v1125_v9 = vadd.f32 %v1124_v5, %v1123_v1  ;;  %v831_v53 = vpop.permute.xlu0 %830  ;;  %v836_v4 = vpop.permute.xlu1 %835  ;;  %v901_v5 = vld [vmem:[%s1733_s2 + $0x58] sm:$0xff] }
 0x113   :  { %v928_v13 = vadd.f32 %v896_v2, %v864_v6  ;;  %v944_v14 = vadd.f32 %v912_v3, %v880_v7  ;;  %v865_v15 = vmul.f32 %v1077_v8, %v1507_v24  ;;  %v881_v16 = vmul.f32 %v1125_v9, %v816_v10  ;;  %v917_v6 = vld [vmem:[%s1733_s2 + $0xd8] sm:$0xff] }
 0x115   :  { %960 = vst [vmem:[%s1734_s4 + $0x30] sm:$0xff] %v928_v13  ;;  %976 = vst [vmem:[%s1734_s4 + $0xb0] sm:$0xff] %v944_v14  ;;  %v929_v23 = vadd.f32 %v897_v11, %v865_v15  ;;  %v945_v19 = vadd.f32 %v913_v12, %v881_v16  ;;  %v1078_v33 = vpop.f32.mrb[16].mxu0  ;;  %v1126_v18 = vpop.f32.mrb[16].mxu1 }
 0x116   :  { %v1079_v34 = vpop.f32.mrb[17].mxu0  ;;  %v1127_v35 = vpop.f32.mrb[17].mxu1 }
 0x117   :  { %961 = vst [vmem:[%s1734_s4 + $0x38] sm:$0xff] %v929_v23  ;;  %977 = vst [vmem:[%s1734_s4 + $0xb8] sm:$0xff] %v945_v19  ;;  %v1080_v24 = vadd.f32 %v1079_v34, %v1078_v33  ;;  %v1128_v36 = vadd.f32 %v1127_v35, %v1126_v18  ;;  %v1081_v37 = vpop.f32.mrb[18].mxu0  ;;  %v1129_v38 = vpop.f32.mrb[18].mxu1  ;;  %v902_v33 = vld [vmem:[%s1733_s2 + $0x60] sm:$0xff] }
 0x118   :  { %v1082_v40 = vpop.f32.mrb[19].mxu0  ;;  %v1130_v41 = vpop.f32.mrb[19].mxu1  ;;  %v918_v18 = vld [vmem:[%s1733_s2 + $0xe0] sm:$0xff] }
 0x119   :  { %v866_v42 = vmul.f32 %v1080_v24, %v1509_v25  ;;  %v882_v43 = vmul.f32 %v1128_v36, %v821_v17  ;;  %v1083_v44 = vadd.f32 %v1082_v40, %v1081_v37  ;;  %v1131_v45 = vadd.f32 %v1130_v41, %v1129_v38  ;;  %v841_v11 = vpop.permute.xlu0 %840  ;;  %v919_v40 = vld [vmem:[%s1733_s2 + $0xe8] sm:$0xff] }
 0x11b   :  { %v930_v49 = vadd.f32 %v898_v20, %v866_v42  ;;  %v946_v50 = vadd.f32 %v914_v39, %v882_v43  ;;  %v867_v51 = vmul.f32 %v1083_v44, %v1511_v26  ;;  %v883_v52 = vmul.f32 %v1131_v45, %v826_v46  ;;  %v846_v20 = vpop.permute.xlu1 %845  ;;  %v903_v39 = vld [vmem:[%s1733_s2 + $0x68] sm:$0xff] }
 0x11d   :  { %962 = vst [vmem:[%s1734_s4 + $0x40] sm:$0xff] %v930_v49  ;;  %978 = vst [vmem:[%s1734_s4 + $0xc0] sm:$0xff] %v946_v50  ;;  %v931_v25 = vadd.f32 %v899_v47, %v867_v51  ;;  %v947_v54 = vadd.f32 %v915_v48, %v883_v52  ;;  %v1084_v55 = vpop.f32.mrb[20].mxu0  ;;  %v1132_v56 = vpop.f32.mrb[20].mxu1 }
 0x11e   :  { %v1085_v57 = vpop.f32.mrb[21].mxu0  ;;  %v1133_v21 = vpop.f32.mrb[21].mxu1 }
 0x11f   :  { %963 = vst [vmem:[%s1734_s4 + $0x48] sm:$0xff] %v931_v25  ;;  %979 = vst [vmem:[%s1734_s4 + $0xc8] sm:$0xff] %v947_v54  ;;  %v1086_v26 = vadd.f32 %v1085_v57, %v1084_v55  ;;  %v1134_v58 = vadd.f32 %v1133_v21, %v1132_v56  ;;  %v1087_v59 = vpop.f32.mrb[22].mxu0  ;;  %v1135_v60 = vpop.f32.mrb[22].mxu1  ;;  %v904_v25 = vld [vmem:[%s1733_s2 + $0x70] sm:$0xff] }
 0x120   :  { %v1088_v22 = vpop.f32.mrb[23].mxu0  ;;  %v1136_v63 = vpop.f32.mrb[23].mxu1  ;;  %v920_v54 = vld [vmem:[%s1733_s2 + $0xf0] sm:$0xff] }
 0x121   :  { %v868_v0 = vmul.f32 %v1086_v26, %v1513_v27  ;;  %v884_v1 = vmul.f32 %v1134_v58, %v831_v53  ;;  %v1089_v2 = vadd.f32 %v1088_v22, %v1087_v59  ;;  %v1137_v3 = vadd.f32 %v1136_v63, %v1135_v60  ;;  %v851_v45 = vpop.permute.xlu0 %850  ;;  %v856_v59 = vpop.permute.xlu1 %855  ;;  %v905_v60 = vld [vmem:[%s1733_s2 + $0x78] sm:$0xff] }
 0x123   :  { %v932_v7 = vadd.f32 %v900_v61, %v868_v0  ;;  %v948_v8 = vadd.f32 %v916_v62, %v884_v1  ;;  %v869_v9 = vmul.f32 %v1089_v2, %v1515_v28  ;;  %v885_v10 = vmul.f32 %v1137_v3, %v836_v4  ;;  %v921_v61 = vld [vmem:[%s1733_s2 + $0xf8] sm:$0xff] }
 0x125   :  { %964 = vst [vmem:[%s1734_s4 + $0x50] sm:$0xff] %v932_v7  ;;  %980 = vst [vmem:[%s1734_s4 + $0xd0] sm:$0xff] %v948_v8  ;;  %v933_v27 = vadd.f32 %v901_v5, %v869_v9  ;;  %v949_v12 = vadd.f32 %v917_v6, %v885_v10  ;;  %v1090_v13 = vpop.f32.mrb[24].mxu0  ;;  %v1138_v14 = vpop.f32.mrb[24].mxu1 }
 0x126   :  { %v1091_v15 = vpop.f32.mrb[25].mxu0  ;;  %v1139_v16 = vpop.f32.mrb[25].mxu1 }
 0x127   :  { %965 = vst [vmem:[%s1734_s4 + $0x58] sm:$0xff] %v933_v27  ;;  %981 = vst [vmem:[%s1734_s4 + $0xd8] sm:$0xff] %v949_v12  ;;  %v1092_v28 = vadd.f32 %v1091_v15, %v1090_v13  ;;  %v1140_v17 = vadd.f32 %v1139_v16, %v1138_v14  ;;  %v1093_v23 = vpop.f32.mrb[26].mxu0  ;;  %v1141_v19 = vpop.f32.mrb[26].mxu1 }
 0x128   :  { %v1094_v34 = vpop.f32.mrb[27].mxu0  ;;  %v1142_v35 = vpop.f32.mrb[27].mxu1 }
 0x129   :  { %v870_v24 = vmul.f32 %v1092_v28, %v1517_v29  ;;  %v886_v36 = vmul.f32 %v1140_v17, %v841_v11  ;;  %v1095_v37 = vadd.f32 %v1094_v34, %v1093_v23  ;;  %v1143_v38 = vadd.f32 %v1142_v35, %v1141_v19 }
 0x12b   :  { %v934_v41 = vadd.f32 %v902_v33, %v870_v24  ;;  %v950_v42 = vadd.f32 %v918_v18, %v886_v36  ;;  %v871_v43 = vmul.f32 %v1095_v37, %v1519_v30  ;;  %v887_v44 = vmul.f32 %v1143_v38, %v846_v20 }
 0x12d   :  { %966 = vst [vmem:[%s1734_s4 + $0x60] sm:$0xff] %v934_v41  ;;  %982 = vst [vmem:[%s1734_s4 + $0xe0] sm:$0xff] %v950_v42  ;;  %v935_v29 = vadd.f32 %v903_v39, %v871_v43  ;;  %v951_v46 = vadd.f32 %v919_v40, %v887_v44  ;;  %v1096_v47 = vpop.f32.mrb[28].mxu0  ;;  %v1144_v48 = vpop.f32.mrb[28].mxu1 }
 0x12e   :  { %v1097_v49 = vpop.f32.mrb[29].mxu0  ;;  %v1145_v50 = vpop.f32.mrb[29].mxu1 }
 0x12f   :  { %967 = vst [vmem:[%s1734_s4 + $0x68] sm:$0xff] %v935_v29  ;;  %983 = vst [vmem:[%s1734_s4 + $0xe8] sm:$0xff] %v951_v46  ;;  %v1098_v30 = vadd.f32 %v1097_v49, %v1096_v47  ;;  %v1146_v51 = vadd.f32 %v1145_v50, %v1144_v48  ;;  %v1099_v52 = vpop.f32.mrb[30].mxu0  ;;  %v1147_v53 = vpop.f32.mrb[30].mxu1 }
 0x130   :  { %v1100_v55 = vpop.f32.mrb[31].mxu0  ;;  %v1148_v56 = vpop.f32.mrb[31].mxu1 }
 0x131   :  { %v872_v57 = vmul.f32 %v1098_v30, %v1521_v31  ;;  %v888_v21 = vmul.f32 %v1146_v51, %v851_v45  ;;  %v1101_v26 = vadd.f32 %v1100_v55, %v1099_v52  ;;  %v1149_v58 = vadd.f32 %v1148_v56, %v1147_v53 }
 0x133   :  { %v936_v62 = vadd.f32 %v904_v25, %v872_v57  ;;  %v952_v22 = vadd.f32 %v920_v54, %v888_v21  ;;  %v873_v63 = vmul.f32 %v1101_v26, %v1523_v32  ;;  %v889_v0 = vmul.f32 %v1149_v58, %v856_v59 }
 0x135   :  { %968 = vst [vmem:[%s1734_s4 + $0x70] sm:$0xff] %v936_v62  ;;  %984 = vst [vmem:[%s1734_s4 + $0xf0] sm:$0xff] %v952_v22  ;;  %v937_v31 = vadd.f32 %v905_v60, %v873_v63  ;;  %v953_v1 = vadd.f32 %v921_v61, %v889_v0 }
 0x137   :  { %969 = vst [vmem:[%s1734_s4 + $0x78] sm:$0xff] %v937_v31  ;;  %985 = vst [vmem:[%s1734_s4 + $0xf8] sm:$0xff] %v953_v1 }

// kernel: graphsage_forward.2
= control target key start
LH: loop header
LB: loop body
LE: loop exit
PB: predicated region body
PF: predicated region fallthrough
CT: control target
= control target key end

     0   :  { %v1265_v1 = vmov 0   ;;  %s1714_s1 = inlined_call_operand.vmem [shape: bf16[256,128], index: 1, kind: input, shape index: {}]   ;;  %s1715_s0 = inlined_call_operand.vmem [shape: bf16[256,256], index: 0, kind: input, shape index: {}]   ;;  %s1716_s3 = inlined_call_operand.vmem [shape: f32[256,1], index: 3, kind: input, shape index: {}]   ;;  %s1717_s2 = inlined_call_operand.vmem [shape: f32[256,128], index: 2, kind: input, shape index: {}]   ;;  %s1718_s4 = inlined_call_operand.vmem [shape: bf16[256,128], index: 4, kind: output, shape index: {}]  }
   0x1   :  { %v1201_v0 = vld [vmem:[%s1714_s1 + $0x40] sm:$0xff]   ;;  %1200 = vset.pattern.permute.xlu1 %v1265_v1  ;;  %1199 = vset.pattern.permute.xlu0 %v1265_v1  ;;  %v1203_v3 = vld [vmem:[%s1714_s1 + $0x48] sm:$0xff]   ;;  %v1205_v5 = vld [vmem:[%s1714_s1 + $0x50] sm:$0xff]  }
   0x2   :  { %v1202_v2 = vld [vmem:[%s1714_s1] sm:$0xff]   ;;  %1070 = vmatprep.subr.bf16.mxu0 %v1201_v0  ;;  %1182 = vmatprep.subr.bf16.mxu1 %v1201_v0  ;;  %v1204_v4 = vld [vmem:[%s1714_s1 + $0x8] sm:$0xff]   ;;  %v1206_v6 = vld [vmem:[%s1714_s1 + $0x10] sm:$0xff]  }
   0x3   :  { %1071 = vmatpush3.bf16.msra.mxu0 %v1202_v2  ;;  %1190 = vmatpush3.bf16.msra.mxu1 %v1202_v2  ;;  %v1207_v7 = vld [vmem:[%s1714_s1 + $0x58] sm:$0xff]   ;;  %v1209_v9 = vld [vmem:[%s1714_s1 + $0x60] sm:$0xff]   ;;  %v1211_v11 = vld [vmem:[%s1714_s1 + $0x68] sm:$0xff]  }
   0x4   :  { %1072 = vmatprep.subr.bf16.mxu0 %v1203_v3  ;;  %1183 = vmatprep.subr.bf16.mxu1 %v1203_v3  ;;  %v1208_v8 = vld [vmem:[%s1714_s1 + $0x18] sm:$0xff]   ;;  %v1210_v10 = vld [vmem:[%s1714_s1 + $0x20] sm:$0xff]   ;;  %v1212_v14 = vld [vmem:[%s1714_s1 + $0x28] sm:$0xff]  }
   0x5   :  { %v1219_v12 = vld [vmem:[%s1715_s0 + $0x4] ss:$8 sps:$4 sm:$0xff]   ;;  %v1213_v15 = vld [vmem:[%s1714_s1 + $0x70] sm:$0xff]   ;;  %v1215_v17 = vld [vmem:[%s1714_s1 + $0x78] sm:$0xff]  }
   0x6   :  { %v1222_v13 = vld [vmem:[%s1715_s0 + $0x84] ss:$8 sps:$4 sm:$0xff]   ;;  %438 = vmatprep.mubr.bf16.mxu0 %v1219_v12  ;;  %v1214_v16 = vld [vmem:[%s1714_s1 + $0x30] sm:$0xff]   ;;  %v1216_v19 = vld [vmem:[%s1714_s1 + $0x38] sm:$0xff]  }
   0x7   :  { %1073 = vmatpush3.bf16.msra.mxu0 %v1204_v4  ;;  %1191 = vmatpush3.bf16.msra.mxu1 %v1204_v4  ;;  %v668_v18 = vld [vmem:[%s1716_s3 + $0x10] sm:$0xff]  ;;  %v666_v20 = vld [vmem:[%s1716_s3] sm:$0xff]  ;;  %v669_v23 = vld [vmem:[%s1716_s3 + $0x18] sm:$0xff] }
   0x8   :  { %1074 = vmatprep.subr.bf16.mxu0 %v1205_v5  ;;  %1184 = vmatprep.subr.bf16.mxu1 %v1205_v5  ;;  %v1217_v21 = vld [vmem:[%s1715_s0] ss:$8 sps:$4 sm:$0xff]   ;;  %v1223_v25 = vld [vmem:[%s1715_s0 + $0x14] ss:$8 sps:$4 sm:$0xff]   ;;  %v1227_v29 = vld [vmem:[%s1715_s0 + $0x10] ss:$8 sps:$4 sm:$0xff]  }
   0x9   :  { %502 = vmatprep.mubr.bf16.mxu1 %v1222_v13  ;;  %710 = vperm.xlu1 %1200, %v668_v18   ;;  %v1220_v22 = vld [vmem:[%s1715_s0 + $0x80] ss:$8 sps:$4 sm:$0xff]   ;;  %v1225_v26 = vld [vmem:[%s1715_s0 + $0x94] ss:$8 sps:$4 sm:$0xff]   ;;  %v1228_v30 = vld [vmem:[%s1715_s0 + $0x90] ss:$8 sps:$4 sm:$0xff]  }
   0xa   :  { %700 = vperm.xlu0 %1199, %v666_v20   ;;  %v667_v24 = vld [vmem:[%s1716_s3 + $0x8] sm:$0xff]  ;;  %v670_v28 = vld [vmem:[%s1716_s3 + $0x20] sm:$0xff]  ;;  %v673_v31 = vld [vmem:[%s1716_s3 + $0x38] sm:$0xff] }
   0xb   :  { %1075 = vmatpush3.bf16.msra.mxu0 %v1206_v6  ;;  %1192 = vmatpush3.bf16.msra.mxu1 %v1206_v6  ;;  %v671_v27 = vld [vmem:[%s1716_s3 + $0x28] sm:$0xff]  ;;  %v672_v32 = vld [vmem:[%s1716_s3 + $0x30] sm:$0xff]  ;;  %v674_v36 = vld [vmem:[%s1716_s3 + $0x40] sm:$0xff] }
   0xc   :  { %1076 = vmatprep.subr.bf16.mxu0 %v1207_v7  ;;  %1185 = vmatprep.subr.bf16.mxu1 %v1207_v7  ;;  %v1229_v33 = vld [vmem:[%s1715_s0 + $0x24] ss:$8 sps:$4 sm:$0xff]   ;;  %v1233_v37 = vld [vmem:[%s1715_s0 + $0x20] ss:$8 sps:$4 sm:$0xff]   ;;  %v677_v39 = vld [vmem:[%s1716_s3 + $0x58] sm:$0xff] }
   0xd   :  { %715 = vperm.xlu1 %1200, %v669_v23   ;;  %v1231_v34 = vld [vmem:[%s1715_s0 + $0xa4] ss:$8 sps:$4 sm:$0xff]   ;;  %v1234_v38 = vld [vmem:[%s1715_s0 + $0xa0] ss:$8 sps:$4 sm:$0xff]   ;;  %v676_v40 = vld [vmem:[%s1716_s3 + $0x50] sm:$0xff] }
   0xe   :  { %705 = vperm.xlu0 %1199, %v667_v24   ;;  %v675_v35 = vld [vmem:[%s1716_s3 + $0x48] sm:$0xff]  ;;  %v1235_v41 = vld [vmem:[%s1715_s0 + $0x34] ss:$8 sps:$4 sm:$0xff]   ;;  %v678_v44 = vld [vmem:[%s1716_s3 + $0x60] sm:$0xff] }
   0xf   :  { %1077 = vmatpush3.bf16.msra.mxu0 %v1208_v8  ;;  %1193 = vmatpush3.bf16.msra.mxu1 %v1208_v8  ;;  %v1237_v42 = vld [vmem:[%s1715_s0 + $0xb4] ss:$8 sps:$4 sm:$0xff]   ;;  %v679_v43 = vld [vmem:[%s1716_s3 + $0x68] sm:$0xff]  ;;  %v1239_v45 = vld [vmem:[%s1715_s0 + $0x30] ss:$8 sps:$4 sm:$0xff]  }
  0x10   :  { %1078 = vmatprep.subr.bf16.mxu0 %v1209_v9  ;;  %1186 = vmatprep.subr.bf16.mxu1 %v1209_v9  ;;  %v1240_v46 = vld [vmem:[%s1715_s0 + $0xb0] ss:$8 sps:$4 sm:$0xff]   ;;  %v1241_v49 = vld [vmem:[%s1715_s0 + $0x44] ss:$8 sps:$4 sm:$0xff]   ;;  %v1245_v53 = vld [vmem:[%s1715_s0 + $0x40] ss:$8 sps:$4 sm:$0xff]  }
  0x11   :  { %725 = vperm.xlu1 %1200, %v671_v27   ;;  %v681_v47 = vld [vmem:[%s1716_s3 + $0x78] sm:$0xff]  ;;  %v680_v48 = vld [vmem:[%s1716_s3 + $0x70] sm:$0xff]  ;;  %v1243_v50 = vld [vmem:[%s1715_s0 + $0xc4] ss:$8 sps:$4 sm:$0xff]  }
  0x12   :  { %720 = vperm.xlu0 %1199, %v670_v28   ;;  %v683_v51 = vld [vmem:[%s1716_s3 + $0x88] sm:$0xff]  ;;  %v682_v52 = vld [vmem:[%s1716_s3 + $0x80] sm:$0xff]  ;;  %v685_v55 = vld [vmem:[%s1716_s3 + $0x98] sm:$0xff] }
  0x13   :  { %1079 = vmatpush3.bf16.msra.mxu0 %v1210_v10  ;;  %1194 = vmatpush3.bf16.msra.mxu1 %v1210_v10  ;;  %v1246_v54 = vld [vmem:[%s1715_s0 + $0xc0] ss:$8 sps:$4 sm:$0xff]   ;;  %v684_v56 = vld [vmem:[%s1716_s3 + $0x90] sm:$0xff]  ;;  %v689_v63 = vld [vmem:[%s1716_s3 + $0xb8] sm:$0xff] }
  0x14   :  { %1080 = vmatprep.subr.bf16.mxu0 %v1211_v11  ;;  %1187 = vmatprep.subr.bf16.mxu1 %v1211_v11  ;;  %v1247_v57 = vld [vmem:[%s1715_s0 + $0x54] ss:$8 sps:$4 sm:$0xff]   ;;  %v687_v59 = vld [vmem:[%s1716_s3 + $0xa8] sm:$0xff]  ;;  %v686_v60 = vld [vmem:[%s1716_s3 + $0xa0] sm:$0xff] }
  0x15   :  { %735 = vperm.xlu1 %1200, %v673_v31   ;;  %v1249_v58 = vld [vmem:[%s1715_s0 + $0xd4] ss:$8 sps:$4 sm:$0xff]   ;;  %v1251_v61 = vld [vmem:[%s1715_s0 + $0x50] ss:$8 sps:$4 sm:$0xff]   ;;  %v1253_v1 = vld [vmem:[%s1715_s0 + $0x64] ss:$8 sps:$4 sm:$0xff]  }
  0x16   :  { %730 = vperm.xlu0 %1199, %v672_v32   ;;  %v1252_v62 = vld [vmem:[%s1715_s0 + $0xd0] ss:$8 sps:$4 sm:$0xff]   ;;  %v1255_v2 = vld [vmem:[%s1715_s0 + $0xe4] ss:$8 sps:$4 sm:$0xff]   ;;  %v1257_v5 = vld [vmem:[%s1715_s0 + $0x60] ss:$8 sps:$4 sm:$0xff]  }
  0x17   :  { %1081 = vmatpush3.bf16.msra.mxu0 %v1212_v14  ;;  %1195 = vmatpush3.bf16.msra.mxu1 %v1212_v14  ;;  %v688_v0 = vld [vmem:[%s1716_s3 + $0xb0] sm:$0xff]  ;;  %v691_v3 = vld [vmem:[%s1716_s3 + $0xc8] sm:$0xff]  ;;  %v690_v4 = vld [vmem:[%s1716_s3 + $0xc0] sm:$0xff] }
  0x18   :  { %1082 = vmatprep.subr.bf16.mxu0 %v1213_v15  ;;  %1188 = vmatprep.subr.bf16.mxu1 %v1213_v15  ;;  %v1258_v6 = vld [vmem:[%s1715_s0 + $0xe0] ss:$8 sps:$4 sm:$0xff]   ;;  %v693_v7 = vld [vmem:[%s1716_s3 + $0xd8] sm:$0xff]  ;;  %v692_v8 = vld [vmem:[%s1716_s3 + $0xd0] sm:$0xff] }
  0x19   :  { %745 = vperm.xlu1 %1200, %v675_v35   ;;  %v1259_v9 = vld [vmem:[%s1715_s0 + $0x74] ss:$8 sps:$4 sm:$0xff]   ;;  %v695_v11 = vld [vmem:[%s1716_s3 + $0xe8] sm:$0xff]  ;;  %v694_v12 = vld [vmem:[%s1716_s3 + $0xe0] sm:$0xff] }
  0x1a   :  { %740 = vperm.xlu0 %1199, %v674_v36   ;;  %v1261_v10 = vld [vmem:[%s1715_s0 + $0xf4] ss:$8 sps:$4 sm:$0xff]   ;;  %v1263_v13 = vld [vmem:[%s1715_s0 + $0x70] ss:$8 sps:$4 sm:$0xff]  }
  0x1b   :  { %1083 = vmatpush3.bf16.msra.mxu0 %v1214_v16  ;;  %1196 = vmatpush3.bf16.msra.mxu1 %v1214_v16  ;;  %v1264_v14 = vld [vmem:[%s1715_s0 + $0xf0] ss:$8 sps:$4 sm:$0xff]  }
  0x1c   :  { %1084 = vmatprep.subr.bf16.mxu0 %v1215_v17  ;;  %1189 = vmatprep.subr.bf16.mxu1 %v1215_v17  ;;  %v697_v15 = vld [vmem:[%s1716_s3 + $0xf8] sm:$0xff]  ;;  %v696_v16 = vld [vmem:[%s1716_s3 + $0xf0] sm:$0xff] }
  0x1d   :  { %755 = vperm.xlu1 %1200, %v677_v39  }
  0x1e   :  { %750 = vperm.xlu0 %1199, %v676_v40  }
  0x1f   :  { %1085 = vmatpush3.bf16.msra.mxu0 %v1216_v19  ;;  %1197 = vmatpush3.bf16.msra.mxu1 %v1216_v19 }
  0x21   :  { %765 = vperm.xlu1 %1200, %v679_v43   ;;  %v906_v43 = vld [vmem:[%s1717_s2 + $0x80] sm:$0xff] }
  0x22   :  { %439 = vmatmul.mubr.bf16.vlgmr.msra.gmra.mrb[0].mxu0 %v1217_v21  ;;  %503 = vmatmul.mubr.bf16.vlgmr.msra.gmra.mrb[0].mxu1 %v1220_v22 }
  0x23   :  { %446 = vmatprep.mubr.bf16.mxu0 %v1223_v25  ;;  %510 = vmatprep.mubr.bf16.mxu1 %v1225_v26 }
  0x24   :  { %760 = vperm.xlu0 %1199, %v678_v44  }
  0x25   :  { %775 = vperm.xlu1 %1200, %v681_v47  }
  0x28   :  { %770 = vperm.xlu0 %1199, %v680_v48  }
  0x29   :  { %785 = vperm.xlu1 %1200, %v683_v51   ;;  %v891_v51 = vld [vmem:[%s1717_s2 + $0x8] sm:$0xff] }
  0x2a   :  { %447 = vmatmul.mubr.bf16.gmra.mrb[4].mxu0 %v1227_v29  ;;  %511 = vmatmul.mubr.bf16.gmra.mrb[4].mxu1 %v1228_v30 }
  0x2b   :  { %454 = vmatprep.mubr.bf16.mxu0 %v1229_v33  ;;  %518 = vmatprep.mubr.bf16.mxu1 %v1231_v34 }
  0x2c   :  { %780 = vperm.xlu0 %1199, %v682_v52   ;;  %v907_v52 = vld [vmem:[%s1717_s2 + $0x88] sm:$0xff] }
  0x2d   :  { %795 = vperm.xlu1 %1200, %v685_v55  }
  0x30   :  { %790 = vperm.xlu0 %1199, %v684_v56  }
  0x31   :  { %805 = vperm.xlu1 %1200, %v687_v59  }
  0x32   :  { %455 = vmatmul.mubr.bf16.gmra.mrb[8].mxu0 %v1233_v37  ;;  %519 = vmatmul.mubr.bf16.gmra.mrb[8].mxu1 %v1234_v38 }
  0x33   :  { %462 = vmatprep.mubr.bf16.mxu0 %v1235_v41  ;;  %526 = vmatprep.mubr.bf16.mxu1 %v1237_v42  ;;  %v890_v42 = vld [vmem:[%s1717_s2] sm:$0xff] }
  0x34   :  { %800 = vperm.xlu0 %1199, %v686_v60  }
  0x35   :  { %815 = vperm.xlu1 %1200, %v689_v63  }
  0x38   :  { %810 = vperm.xlu0 %1199, %v688_v0  }
  0x39   :  { %825 = vperm.xlu1 %1200, %v691_v3  }
  0x3a   :  { %463 = vmatmul.mubr.bf16.gmra.mrb[12].mxu0 %v1239_v45  ;;  %527 = vmatmul.mubr.bf16.gmra.mrb[12].mxu1 %v1240_v46 }
  0x3b   :  { %470 = vmatprep.mubr.bf16.mxu0 %v1241_v49  ;;  %534 = vmatprep.mubr.bf16.mxu1 %v1243_v50 }
  0x3c   :  { %820 = vperm.xlu0 %1199, %v690_v4  }
  0x3d   :  { %835 = vperm.xlu1 %1200, %v693_v7  }
  0x40   :  { %830 = vperm.xlu0 %1199, %v692_v8  }
  0x41   :  { %845 = vperm.xlu1 %1200, %v695_v11  }
  0x42   :  { %471 = vmatmul.mubr.bf16.gmra.mrb[16].mxu0 %v1245_v53  ;;  %535 = vmatmul.mubr.bf16.gmra.mrb[16].mxu1 %v1246_v54 }
  0x43   :  { %478 = vmatprep.mubr.bf16.mxu0 %v1247_v57  ;;  %542 = vmatprep.mubr.bf16.mxu1 %v1249_v58 }
  0x44   :  { %840 = vperm.xlu0 %1199, %v694_v12  }
  0x45   :  { %855 = vperm.xlu1 %1200, %v697_v15   ;;  %v908_v15 = vld [vmem:[%s1717_s2 + $0x90] sm:$0xff] }
  0x48   :  { %850 = vperm.xlu0 %1199, %v696_v16  }
  0x4a   :  { %479 = vmatmul.mubr.bf16.gmra.mrb[20].mxu0 %v1251_v61  ;;  %543 = vmatmul.mubr.bf16.gmra.mrb[20].mxu1 %v1252_v62 }
  0x4b   :  { %486 = vmatprep.mubr.bf16.mxu0 %v1253_v1  ;;  %550 = vmatprep.mubr.bf16.mxu1 %v1255_v2 }
  0x52   :  { %487 = vmatmul.mubr.bf16.gmra.mrb[24].mxu0 %v1257_v5  ;;  %551 = vmatmul.mubr.bf16.gmra.mrb[24].mxu1 %v1258_v6 }
  0x53   :  { %494 = vmatprep.mubr.bf16.mxu0 %v1259_v9  ;;  %558 = vmatprep.mubr.bf16.mxu1 %v1261_v10 }
  0x5a   :  { %495 = vmatmul.mubr.bf16.gmra.mrb[28].mxu0 %v1263_v13  ;;  %559 = vmatmul.mubr.bf16.gmra.mrb[28].mxu1 %v1264_v14  ;;  %v892_v13 = vld [vmem:[%s1717_s2 + $0x10] sm:$0xff] }
  0x88   :  { %v711_v18 = vpop.permute.xlu1 %710 }
  0x89   :  { %v701_v17 = vpop.permute.xlu0 %700 }
  0x8c   :  { %v1531_v20 = vpop.permute.xlu1 %715 }
  0x8d   :  { %v706_v19 = vpop.permute.xlu0 %705 }
  0x90   :  { %v1535_v22 = vpop.permute.xlu1 %725 }
  0x91   :  { %v1533_v21 = vpop.permute.xlu0 %720 }
  0x94   :  { %v1539_v24 = vpop.permute.xlu1 %735 }
  0x95   :  { %v1537_v23 = vpop.permute.xlu0 %730 }
  0x98   :  { %v1543_v26 = vpop.permute.xlu1 %745 }
  0x99   :  { %v1541_v25 = vpop.permute.xlu0 %740 }
  0x9c   :  { %v1547_v28 = vpop.permute.xlu1 %755 }
  0x9d   :  { %v1545_v27 = vpop.permute.xlu0 %750 }
  0xa0   :  { %v1551_v30 = vpop.permute.xlu1 %765 }
  0xa3   :  { %v1549_v29 = vpop.permute.xlu0 %760 }
  0xa4   :  { %v1555_v32 = vpop.permute.xlu1 %775 }
  0xa7   :  { %v1553_v31 = vpop.permute.xlu0 %770 }
  0xa8   :  { %v786_v50 = vpop.permute.xlu1 %785 }
  0xab   :  { %v781_v33 = vpop.permute.xlu0 %780 }
  0xaf   :  { %v791_v57 = vpop.permute.xlu0 %790 }
  0xf5   :  { %v1086_v34 = vpop.f32.mrb[0].mxu0  ;;  %v1134_v35 = vpop.f32.mrb[0].mxu1 }
  0xf6   :  { %v1087_v36 = vpop.f32.mrb[1].mxu0  ;;  %v1135_v37 = vpop.f32.mrb[1].mxu1 }
  0xf7   :  { %v1088_v38 = vadd.f32 %v1087_v36, %v1086_v34  ;;  %v1136_v39 = vadd.f32 %v1135_v37, %v1134_v35  ;;  %v1089_v40 = vpop.f32.mrb[2].mxu0  ;;  %v1137_v41 = vpop.f32.mrb[2].mxu1 }
  0xf8   :  { %v1090_v44 = vpop.f32.mrb[3].mxu0  ;;  %v1138_v45 = vpop.f32.mrb[3].mxu1 }
  0xf9   :  { %v858_v46 = vmul.f32 %v1088_v38, %v701_v17  ;;  %v874_v47 = vmul.f32 %v1136_v39, %v781_v33  ;;  %v1091_v48 = vadd.f32 %v1090_v44, %v1089_v40  ;;  %v1139_v49 = vadd.f32 %v1138_v45, %v1137_v41  ;;  %v909_v33 = vld [vmem:[%s1717_s2 + $0x98] sm:$0xff]  ;;  %v801_v34 = vpop.permute.xlu0 %800 }
  0xfb   :  { %v922_v53 = vadd.f32 %v890_v42, %v858_v46  ;;  %v938_v54 = vadd.f32 %v906_v43, %v874_v47  ;;  %v859_v55 = vmul.f32 %v1091_v48, %v706_v19  ;;  %v875_v56 = vmul.f32 %v1139_v49, %v786_v50  ;;  %v796_v19 = vpop.permute.xlu1 %795  ;;  %v894_v46 = vld [vmem:[%s1717_s2 + $0x20] sm:$0xff] }
  0xfc   :  { %v910_v48 = vld [vmem:[%s1717_s2 + $0xa0] sm:$0xff] }
  0xfd   :  { %v923_v58 = vadd.f32 %v891_v51, %v859_v55  ;;  %v939_v59 = vadd.f32 %v907_v52, %v875_v56  ;;  %v1092_v60 = vpop.f32.mrb[4].mxu0  ;;  %v1140_v61 = vpop.f32.mrb[4].mxu1  ;;  %v954_v62 = vmax.f32 %v922_v53, 0.0  ;;  %v970_v63 = vmax.f32 %v938_v54, 0.0 }
  0xfe   :  { %v1093_v0 = vpop.f32.mrb[5].mxu0  ;;  %v1141_v1 = vpop.f32.mrb[5].mxu1 }
  0xff   :  { %v955_v2 = vmax.f32 %v923_v58, 0.0  ;;  %v971_v3 = vmax.f32 %v939_v59, 0.0  ;;  %v1094_v4 = vadd.f32 %v1093_v0, %v1092_v60  ;;  %v1142_v5 = vadd.f32 %v1141_v1, %v1140_v61  ;;  %v1095_v6 = vpop.f32.mrb[6].mxu0  ;;  %v1143_v7 = vpop.f32.mrb[6].mxu1  ;;  %v911_v0 = vld [vmem:[%s1717_s2 + $0xa8] sm:$0xff] }
 0x100   :  { %v1096_v8 = vpop.f32.mrb[7].mxu0  ;;  %v1144_v9 = vpop.f32.mrb[7].mxu1 }
 0x101   :  { %v986_v10 = vpack.c.bf16 %v955_v2, %v954_v62  ;;  %v994_v11 = vpack.c.bf16 %v971_v3, %v970_v63  ;;  %v860_v12 = vmul.f32 %v1094_v4, %v711_v18  ;;  %v876_v14 = vmul.f32 %v1142_v5, %v791_v57  ;;  %v893_v18 = vld [vmem:[%s1717_s2 + $0x18] sm:$0xff]  ;;  %v806_v60 = vpop.permute.xlu1 %805  ;;  %v895_v63 = vld [vmem:[%s1717_s2 + $0x28] sm:$0xff] }
 0x102   :  { %v1097_v16 = vadd.f32 %v1096_v8, %v1095_v6  ;;  %v1145_v17 = vadd.f32 %v1144_v9, %v1143_v7 }
 0x103   :  { %1002 = vst [vmem:[%s1718_s4] sm:$0xff] %v986_v10  ;;  %1010 = vst [vmem:[%s1718_s4 + $0x40] sm:$0xff] %v994_v11  ;;  %v924_v35 = vadd.f32 %v892_v13, %v860_v12  ;;  %v940_v36 = vadd.f32 %v908_v15, %v876_v14 }
 0x104   :  { %v861_v37 = vmul.f32 %v1097_v16, %v1531_v20  ;;  %v877_v38 = vmul.f32 %v1145_v17, %v796_v19 }
 0x105   :  { %v1098_v39 = vpop.f32.mrb[8].mxu0  ;;  %v1146_v40 = vpop.f32.mrb[8].mxu1  ;;  %v956_v20 = vmax.f32 %v924_v35, 0.0  ;;  %v972_v51 = vmax.f32 %v940_v36, 0.0  ;;  %v896_v36 = vld [vmem:[%s1717_s2 + $0x30] sm:$0xff] }
 0x106   :  { %v925_v41 = vadd.f32 %v893_v18, %v861_v37  ;;  %v941_v42 = vadd.f32 %v909_v33, %v877_v38  ;;  %v1099_v43 = vpop.f32.mrb[9].mxu0  ;;  %v1147_v44 = vpop.f32.mrb[9].mxu1  ;;  %v912_v38 = vld [vmem:[%s1717_s2 + $0xb0] sm:$0xff] }
 0x107   :  { %v1100_v45 = vadd.f32 %v1099_v43, %v1098_v39  ;;  %v1148_v47 = vadd.f32 %v1147_v44, %v1146_v40  ;;  %v1101_v49 = vpop.f32.mrb[10].mxu0  ;;  %v1149_v50 = vpop.f32.mrb[10].mxu1 }
 0x108   :  { %v957_v52 = vmax.f32 %v925_v41, 0.0  ;;  %v973_v53 = vmax.f32 %v941_v42, 0.0  ;;  %v1102_v54 = vpop.f32.mrb[11].mxu0  ;;  %v1150_v55 = vpop.f32.mrb[11].mxu1  ;;  %v913_v42 = vld [vmem:[%s1717_s2 + $0xb8] sm:$0xff] }
 0x109   :  { %v862_v56 = vmul.f32 %v1100_v45, %v1533_v21  ;;  %v878_v57 = vmul.f32 %v1148_v47, %v801_v34  ;;  %v1103_v58 = vadd.f32 %v1102_v54, %v1101_v49  ;;  %v1151_v59 = vadd.f32 %v1150_v55, %v1149_v50  ;;  %v811_v21 = vpop.permute.xlu0 %810  ;;  %v816_v41 = vpop.permute.xlu1 %815  ;;  %v898_v54 = vld [vmem:[%s1717_s2 + $0x40] sm:$0xff] }
 0x10a   :  { %v987_v61 = vpack.c.bf16 %v957_v52, %v956_v20  ;;  %v995_v62 = vpack.c.bf16 %v973_v53, %v972_v51 }
 0x10b   :  { %v926_v1 = vadd.f32 %v894_v46, %v862_v56  ;;  %v942_v2 = vadd.f32 %v910_v48, %v878_v57  ;;  %v863_v3 = vmul.f32 %v1103_v58, %v1535_v22  ;;  %v879_v4 = vmul.f32 %v1151_v59, %v806_v60  ;;  %v914_v56 = vld [vmem:[%s1717_s2 + $0xc0] sm:$0xff] }
 0x10c   :  { %1003 = vst [vmem:[%s1718_s4 + $0x8] sm:$0xff] %v987_v61  ;;  %1011 = vst [vmem:[%s1718_s4 + $0x48] sm:$0xff] %v995_v62 }
 0x10d   :  { %v927_v5 = vadd.f32 %v895_v63, %v863_v3  ;;  %v943_v6 = vadd.f32 %v911_v0, %v879_v4  ;;  %v1104_v7 = vpop.f32.mrb[12].mxu0  ;;  %v1152_v8 = vpop.f32.mrb[12].mxu1  ;;  %v958_v9 = vmax.f32 %v926_v1, 0.0  ;;  %v974_v10 = vmax.f32 %v942_v2, 0.0 }
 0x10e   :  { %v1105_v11 = vpop.f32.mrb[13].mxu0  ;;  %v1153_v12 = vpop.f32.mrb[13].mxu1 }
 0x10f   :  { %v959_v13 = vmax.f32 %v927_v5, 0.0  ;;  %v975_v22 = vmax.f32 %v943_v6, 0.0  ;;  %v1106_v14 = vadd.f32 %v1105_v11, %v1104_v7  ;;  %v1154_v15 = vadd.f32 %v1153_v12, %v1152_v8  ;;  %v1107_v16 = vpop.f32.mrb[14].mxu0  ;;  %v1155_v17 = vpop.f32.mrb[14].mxu1  ;;  %v899_v6 = vld [vmem:[%s1717_s2 + $0x48] sm:$0xff] }
 0x110   :  { %v1108_v19 = vpop.f32.mrb[15].mxu0  ;;  %v1156_v18 = vpop.f32.mrb[15].mxu1  ;;  %v915_v7 = vld [vmem:[%s1717_s2 + $0xc8] sm:$0xff] }
 0x111   :  { %v988_v33 = vpack.c.bf16 %v959_v13, %v958_v9  ;;  %v996_v34 = vpack.c.bf16 %v975_v22, %v974_v10  ;;  %v864_v35 = vmul.f32 %v1106_v14, %v1537_v23  ;;  %v880_v37 = vmul.f32 %v1154_v15, %v811_v21  ;;  %v897_v23 = vld [vmem:[%s1717_s2 + $0x38] sm:$0xff]  ;;  %v821_v43 = vpop.permute.xlu0 %820  ;;  %v826_v4 = vpop.permute.xlu1 %825 }
 0x112   :  { %v1109_v39 = vadd.f32 %v1108_v19, %v1107_v16  ;;  %v1157_v40 = vadd.f32 %v1156_v18, %v1155_v17 }
 0x113   :  { %1004 = vst [vmem:[%s1718_s4 + $0x10] sm:$0xff] %v988_v33  ;;  %1012 = vst [vmem:[%s1718_s4 + $0x50] sm:$0xff] %v996_v34  ;;  %v928_v44 = vadd.f32 %v896_v36, %v864_v35  ;;  %v944_v45 = vadd.f32 %v912_v38, %v880_v37 }
 0x114   :  { %v865_v46 = vmul.f32 %v1109_v39, %v1539_v24  ;;  %v881_v47 = vmul.f32 %v1157_v40, %v816_v41 }
 0x115   :  { %v1110_v48 = vpop.f32.mrb[16].mxu0  ;;  %v1158_v49 = vpop.f32.mrb[16].mxu1  ;;  %v960_v24 = vmax.f32 %v928_v44, 0.0  ;;  %v976_v59 = vmax.f32 %v944_v45, 0.0 }
 0x116   :  { %v929_v50 = vadd.f32 %v897_v23, %v865_v46  ;;  %v945_v20 = vadd.f32 %v913_v42, %v881_v47  ;;  %v1111_v51 = vpop.f32.mrb[17].mxu0  ;;  %v1159_v52 = vpop.f32.mrb[17].mxu1  ;;  %v900_v23 = vld [vmem:[%s1717_s2 + $0x50] sm:$0xff]  ;;  %v917_v47 = vld [vmem:[%s1717_s2 + $0xd8] sm:$0xff] }
 0x117   :  { %v1112_v53 = vadd.f32 %v1111_v51, %v1110_v48  ;;  %v1160_v55 = vadd.f32 %v1159_v52, %v1158_v49  ;;  %v1113_v57 = vpop.f32.mrb[18].mxu0  ;;  %v1161_v58 = vpop.f32.mrb[18].mxu1 }
 0x118   :  { %v961_v60 = vmax.f32 %v929_v50, 0.0  ;;  %v977_v61 = vmax.f32 %v945_v20, 0.0  ;;  %v1114_v62 = vpop.f32.mrb[19].mxu0  ;;  %v1162_v63 = vpop.f32.mrb[19].mxu1 }
 0x119   :  { %v866_v0 = vmul.f32 %v1112_v53, %v1541_v25  ;;  %v882_v1 = vmul.f32 %v1160_v55, %v821_v43  ;;  %v1115_v2 = vadd.f32 %v1114_v62, %v1113_v57  ;;  %v1163_v3 = vadd.f32 %v1162_v63, %v1161_v58  ;;  %v831_v25 = vpop.permute.xlu0 %830  ;;  %v916_v43 = vld [vmem:[%s1717_s2 + $0xd0] sm:$0xff]  ;;  %v836_v46 = vpop.permute.xlu1 %835 }
 0x11a   :  { %v989_v21 = vpack.c.bf16 %v961_v60, %v960_v24  ;;  %v997_v5 = vpack.c.bf16 %v977_v61, %v976_v59  ;;  %v902_v24 = vld [vmem:[%s1717_s2 + $0x60] sm:$0xff] }
 0x11b   :  { %v930_v8 = vadd.f32 %v898_v54, %v866_v0  ;;  %v946_v9 = vadd.f32 %v914_v56, %v882_v1  ;;  %v867_v10 = vmul.f32 %v1115_v2, %v1543_v26  ;;  %v883_v11 = vmul.f32 %v1163_v3, %v826_v4  ;;  %v918_v60 = vld [vmem:[%s1717_s2 + $0xe0] sm:$0xff] }
 0x11c   :  { %1005 = vst [vmem:[%s1718_s4 + $0x18] sm:$0xff] %v989_v21  ;;  %1013 = vst [vmem:[%s1718_s4 + $0x58] sm:$0xff] %v997_v5 }
 0x11d   :  { %v931_v12 = vadd.f32 %v899_v6, %v867_v10  ;;  %v947_v13 = vadd.f32 %v915_v7, %v883_v11  ;;  %v1116_v22 = vpop.f32.mrb[20].mxu0  ;;  %v1164_v14 = vpop.f32.mrb[20].mxu1  ;;  %v962_v15 = vmax.f32 %v930_v8, 0.0  ;;  %v978_v16 = vmax.f32 %v946_v9, 0.0  ;;  %v903_v10 = vld [vmem:[%s1717_s2 + $0x68] sm:$0xff] }
 0x11e   :  { %v1117_v17 = vpop.f32.mrb[21].mxu0  ;;  %v1165_v19 = vpop.f32.mrb[21].mxu1  ;;  %v919_v11 = vld [vmem:[%s1717_s2 + $0xe8] sm:$0xff] }
 0x11f   :  { %v963_v18 = vmax.f32 %v931_v12, 0.0  ;;  %v979_v26 = vmax.f32 %v947_v13, 0.0  ;;  %v1118_v33 = vadd.f32 %v1117_v17, %v1116_v22  ;;  %v1166_v34 = vadd.f32 %v1165_v19, %v1164_v14  ;;  %v1119_v35 = vpop.f32.mrb[22].mxu0  ;;  %v1167_v36 = vpop.f32.mrb[22].mxu1 }
 0x120   :  { %v1120_v37 = vpop.f32.mrb[23].mxu0  ;;  %v1168_v38 = vpop.f32.mrb[23].mxu1 }
 0x121   :  { %v990_v39 = vpack.c.bf16 %v963_v18, %v962_v15  ;;  %v998_v40 = vpack.c.bf16 %v979_v26, %v978_v16  ;;  %v868_v41 = vmul.f32 %v1118_v33, %v1545_v27  ;;  %v884_v42 = vmul.f32 %v1166_v34, %v831_v25  ;;  %v901_v27 = vld [vmem:[%s1717_s2 + $0x58] sm:$0xff]  ;;  %v841_v48 = vpop.permute.xlu0 %840  ;;  %v846_v7 = vpop.permute.xlu1 %845 }
 0x122   :  { %v1121_v44 = vadd.f32 %v1120_v37, %v1119_v35  ;;  %v1169_v45 = vadd.f32 %v1168_v38, %v1167_v36 }
 0x123   :  { %1006 = vst [vmem:[%s1718_s4 + $0x20] sm:$0xff] %v990_v39  ;;  %1014 = vst [vmem:[%s1718_s4 + $0x60] sm:$0xff] %v998_v40  ;;  %v932_v49 = vadd.f32 %v900_v23, %v868_v41  ;;  %v948_v50 = vadd.f32 %v916_v43, %v884_v42  ;;  %v904_v43 = vld [vmem:[%s1717_s2 + $0x70] sm:$0xff] }
 0x124   :  { %v869_v20 = vmul.f32 %v1121_v44, %v1547_v28  ;;  %v885_v51 = vmul.f32 %v1169_v45, %v836_v46  ;;  %v920_v45 = vld [vmem:[%s1717_s2 + $0xf0] sm:$0xff] }
 0x125   :  { %v1122_v52 = vpop.f32.mrb[24].mxu0  ;;  %v1170_v53 = vpop.f32.mrb[24].mxu1  ;;  %v964_v28 = vmax.f32 %v932_v49, 0.0  ;;  %v980_v63 = vmax.f32 %v948_v50, 0.0 }
 0x126   :  { %v933_v54 = vadd.f32 %v901_v27, %v869_v20  ;;  %v949_v55 = vadd.f32 %v917_v47, %v885_v51  ;;  %v1123_v56 = vpop.f32.mrb[25].mxu0  ;;  %v1171_v57 = vpop.f32.mrb[25].mxu1 }
 0x127   :  { %v1124_v58 = vadd.f32 %v1123_v56, %v1122_v52  ;;  %v1172_v59 = vadd.f32 %v1171_v57, %v1170_v53  ;;  %v1125_v61 = vpop.f32.mrb[26].mxu0  ;;  %v1173_v62 = vpop.f32.mrb[26].mxu1 }
 0x128   :  { %v965_v0 = vmax.f32 %v933_v54, 0.0  ;;  %v981_v1 = vmax.f32 %v949_v55, 0.0  ;;  %v1126_v2 = vpop.f32.mrb[27].mxu0  ;;  %v1174_v3 = vpop.f32.mrb[27].mxu1 }
 0x129   :  { %v870_v4 = vmul.f32 %v1124_v58, %v1549_v29  ;;  %v886_v21 = vmul.f32 %v1172_v59, %v841_v48  ;;  %v1127_v5 = vadd.f32 %v1126_v2, %v1125_v61  ;;  %v1175_v6 = vadd.f32 %v1174_v3, %v1173_v62  ;;  %v851_v29 = vpop.permute.xlu0 %850  ;;  %v856_v47 = vpop.permute.xlu1 %855  ;;  %v921_v48 = vld [vmem:[%s1717_s2 + $0xf8] sm:$0xff] }
 0x12a   :  { %v991_v8 = vpack.c.bf16 %v965_v0, %v964_v28  ;;  %v999_v9 = vpack.c.bf16 %v981_v1, %v980_v63 }
 0x12b   :  { %v934_v25 = vadd.f32 %v902_v24, %v870_v4  ;;  %v950_v12 = vadd.f32 %v918_v60, %v886_v21  ;;  %v871_v13 = vmul.f32 %v1127_v5, %v1551_v30  ;;  %v887_v22 = vmul.f32 %v1175_v6, %v846_v7 }
 0x12c   :  { %1007 = vst [vmem:[%s1718_s4 + $0x28] sm:$0xff] %v991_v8  ;;  %1015 = vst [vmem:[%s1718_s4 + $0x68] sm:$0xff] %v999_v9 }
 0x12d   :  { %v935_v14 = vadd.f32 %v903_v10, %v871_v13  ;;  %v951_v15 = vadd.f32 %v919_v11, %v887_v22  ;;  %v1128_v16 = vpop.f32.mrb[28].mxu0  ;;  %v1176_v17 = vpop.f32.mrb[28].mxu1  ;;  %v966_v19 = vmax.f32 %v934_v25, 0.0  ;;  %v982_v18 = vmax.f32 %v950_v12, 0.0 }
 0x12e   :  { %v1129_v26 = vpop.f32.mrb[29].mxu0  ;;  %v1177_v33 = vpop.f32.mrb[29].mxu1 }
 0x12f   :  { %v967_v34 = vmax.f32 %v935_v14, 0.0  ;;  %v983_v30 = vmax.f32 %v951_v15, 0.0  ;;  %v1130_v35 = vadd.f32 %v1129_v26, %v1128_v16  ;;  %v1178_v36 = vadd.f32 %v1177_v33, %v1176_v17  ;;  %v1131_v37 = vpop.f32.mrb[30].mxu0  ;;  %v1179_v38 = vpop.f32.mrb[30].mxu1 }
 0x130   :  { %v1132_v39 = vpop.f32.mrb[31].mxu0  ;;  %v1180_v40 = vpop.f32.mrb[31].mxu1 }
 0x131   :  { %v992_v41 = vpack.c.bf16 %v967_v34, %v966_v19  ;;  %v1000_v23 = vpack.c.bf16 %v983_v30, %v982_v18  ;;  %v872_v42 = vmul.f32 %v1130_v35, %v1553_v31  ;;  %v888_v44 = vmul.f32 %v1178_v36, %v851_v29  ;;  %v905_v31 = vld [vmem:[%s1717_s2 + $0x78] sm:$0xff] }
 0x132   :  { %v1133_v46 = vadd.f32 %v1132_v39, %v1131_v37  ;;  %v1181_v27 = vadd.f32 %v1180_v40, %v1179_v38 }
 0x133   :  { %1008 = vst [vmem:[%s1718_s4 + $0x30] sm:$0xff] %v992_v41  ;;  %1016 = vst [vmem:[%s1718_s4 + $0x70] sm:$0xff] %v1000_v23  ;;  %v936_v49 = vadd.f32 %v904_v43, %v872_v42  ;;  %v952_v50 = vadd.f32 %v920_v45, %v888_v44 }
 0x134   :  { %v873_v20 = vmul.f32 %v1133_v46, %v1555_v32  ;;  %v889_v51 = vmul.f32 %v1181_v27, %v856_v47 }
 0x135   :  { %v968_v54 = vmax.f32 %v936_v49, 0.0  ;;  %v984_v55 = vmax.f32 %v952_v50, 0.0 }
 0x136   :  { %v937_v52 = vadd.f32 %v905_v31, %v873_v20  ;;  %v953_v53 = vadd.f32 %v921_v48, %v889_v51 }
 0x138   :  { %v969_v56 = vmax.f32 %v937_v52, 0.0  ;;  %v985_v57 = vmax.f32 %v953_v53, 0.0 }
 0x13a   :  { %v993_v58 = vpack.c.bf16 %v969_v56, %v968_v54  ;;  %v1001_v24 = vpack.c.bf16 %v985_v57, %v984_v55 }
 0x13c   :  { %1009 = vst [vmem:[%s1718_s4 + $0x38] sm:$0xff] %v993_v58  ;;  %1017 = vst [vmem:[%s1718_s4 + $0x78] sm:$0xff] %v1001_v24 }

</bundles_post_ra>
